<compile_context>
chip_gen: v7x
topology: tpu7x:2x2x1
jax: 0.10.0
libtpu: 0.0.40
codegen_flags: <defaults>
</compile_context>

<pallas_src>
import functools

import jax
import jax.numpy as jnp
from jax import lax
from jax.experimental import pallas as pl
from jax.experimental.pallas import tpu as pltpu

LANE = 128            # lane width: keep stored outputs lane-dense
ROW_ALIGN = 16        # sublane alignment safe for bf16 (16,128) and f32 (8,128)
DEFAULT_TM = 512      # M tile (~85% HBM roofline, fits VMEM on all generations)
VMEM_LIMIT = 48 * 1024 * 1024


def _round_up(x, m):
    return (x + m - 1) // m * m


def _pad_axis(a, axis, target):
    pad = target - a.shape[axis]
    if pad == 0:
        return a
    widths = [(0, 0)] * a.ndim
    widths[axis] = (0, pad)
    return jnp.pad(a, widths)


# ----------------------------------------------------------------------------
# Pallas kernels
# ----------------------------------------------------------------------------
def _conv_kernel(p_ref, w_ref, o_ref, *, apply_lrelu):
    """One M-tile of conv-as-matmul (bf16 operands, f32 MXU accumulate),
    optional fused LeakyReLU(0.2)."""
    acc = jnp.dot(p_ref[...], w_ref[...], preferred_element_type=jnp.float32)
    if apply_lrelu:
        acc = jnp.where(acc >= 0, acc, 0.2 * acc)
    o_ref[...] = acc.astype(o_ref.dtype)


def _conv_stats_kernel(p_ref, w_ref, o_ref, stats_ref):
    """Conv-as-matmul tile + per-channel sum / sum-of-squares fused into the
    epilogue (feeds BatchNorm without re-reading the activation)."""
    acc = jnp.dot(p_ref[...], w_ref[...], preferred_element_type=jnp.float32)
    o_ref[...] = acc
    ssum = jnp.sum(acc, axis=0, keepdims=True)        # (1, N_pad)
    ssq = jnp.sum(acc * acc, axis=0, keepdims=True)   # (1, N_pad)
    stats_ref[...] = jnp.concatenate([ssum, ssq], axis=0)[None]   # (1, 2, N_pad)


def _bn_lrelu_kernel(y_ref, scale_ref, shift_ref, o_ref):
    """Apply precomputed per-channel affine (BatchNorm) + LeakyReLU(0.2)."""
    z = y_ref[...] * scale_ref[...] + shift_ref[...]
    o_ref[...] = jnp.where(z >= 0, z, 0.2 * z).astype(o_ref.dtype)


# ----------------------------------------------------------------------------
# Pallas wrappers
# ----------------------------------------------------------------------------
def _conv_tiling(M, tm):
    TM = min(tm, _round_up(M, ROW_ALIGN))
    M_pad = _round_up(M, TM)
    return TM, M_pad


def _conv_compiler_params():
    return pltpu.CompilerParams(dimension_semantics=("parallel",),
                                vmem_limit_bytes=VMEM_LIMIT)


def conv_lrelu(patches, w_mat, *, apply_lrelu, out_dtype, tm=DEFAULT_TM):
    """conv output = patches @ w, tiled over rows, optional fused LeakyReLU."""
    M, K = patches.shape
    _, N = w_mat.shape
    N_pad = _round_up(N, LANE)                 # lane-dense stores
    TM, M_pad = _conv_tiling(M, tm)
    p = _pad_axis(patches.astype(jnp.bfloat16), 0, M_pad)   # zero rows -> zero out
    w = _pad_axis(w_mat.astype(jnp.bfloat16), 1, N_pad)     # zero cols -> zero ch
    grid = (M_pad // TM,)
    cost = pl.CostEstimate(
        flops=2 * M_pad * K * N_pad, transcendentals=0,
        bytes_accessed=2 * M_pad * K + 2 * K * N_pad
        + M_pad * N_pad * jnp.dtype(out_dtype).itemsize)
    y = pl.pallas_call(
        functools.partial(_conv_kernel, apply_lrelu=apply_lrelu),
        out_shape=jax.ShapeDtypeStruct((M_pad, N_pad), out_dtype),
        grid=grid,
        in_specs=[pl.BlockSpec((TM, K), lambda i: (i, 0)),
                  pl.BlockSpec((K, N_pad), lambda i: (0, 0))],
        out_specs=pl.BlockSpec((TM, N_pad), lambda i: (i, 0)),
        compiler_params=_conv_compiler_params(),
        cost_estimate=cost,
    )(p, w)
    return y, M, N


def conv_stats(patches, w_mat, *, tm=DEFAULT_TM):
    """Conv-as-matmul with per-tile channel sum/sumsq emitted alongside the
    f32 output (padded rows are zero so they contribute nothing to the stats)."""
    M, K = patches.shape
    _, N = w_mat.shape
    N_pad = _round_up(N, LANE)
    TM, M_pad = _conv_tiling(M, tm)
    p = _pad_axis(patches.astype(jnp.bfloat16), 0, M_pad)
    w = _pad_axis(w_mat.astype(jnp.bfloat16), 1, N_pad)
    ntiles = M_pad // TM
    cost = pl.CostEstimate(
        flops=2 * M_pad * K * N_pad + 3 * M_pad * N_pad, transcendentals=0,
        bytes_accessed=2 * M_pad * K + 2 * K * N_pad + 4 * M_pad * N_pad
        + 4 * ntiles * 2 * N_pad)
    y, stats = pl.pallas_call(
        _conv_stats_kernel,
        out_shape=(jax.ShapeDtypeStruct((M_pad, N_pad), jnp.float32),
                   jax.ShapeDtypeStruct((ntiles, 2, N_pad), jnp.float32)),
        grid=(ntiles,),
        in_specs=[pl.BlockSpec((TM, K), lambda i: (i, 0)),
                  pl.BlockSpec((K, N_pad), lambda i: (0, 0))],
        out_specs=(pl.BlockSpec((TM, N_pad), lambda i: (i, 0)),
                   pl.BlockSpec((1, 2, N_pad), lambda i: (i, 0, 0))),
        compiler_params=_conv_compiler_params(),
        cost_estimate=cost,
    )(p, w)
    return y, stats, M, N


def bn_lrelu(y_pad, stats, gamma, beta, m_real, *, out_dtype=jnp.bfloat16,
             tm=DEFAULT_TM):
    """BatchNorm2d (training-mode batch stats, biased variance, eps=1e-5) +
    LeakyReLU(0.2).  Per-channel mean/var come from the conv-epilogue stats;
    the kernel only applies a per-channel affine + activation, tiled over rows."""
    M_pad, N_pad = y_pad.shape
    ssum = jnp.sum(stats[:, 0, :], axis=0)              # (N_pad,)
    ssq = jnp.sum(stats[:, 1, :], axis=0)
    mean = ssum / m_real
    var = jnp.maximum(ssq / m_real - mean * mean, 0.0)   # biased variance
    inv = lax.rsqrt(var + 1e-5)
    g = _pad_axis(gamma.astype(jnp.float32), 0, N_pad)
    b = _pad_axis(beta.astype(jnp.float32), 0, N_pad)
    scale = (g * inv).reshape(1, N_pad)
    shift = (b - mean * g * inv).reshape(1, N_pad)

    TM = min(tm, M_pad)
    assert M_pad % TM == 0
    grid = (M_pad // TM,)
    cost = pl.CostEstimate(
        flops=3 * M_pad * N_pad, transcendentals=0,
        bytes_accessed=4 * M_pad * N_pad
        + M_pad * N_pad * jnp.dtype(out_dtype).itemsize)
    return pl.pallas_call(
        _bn_lrelu_kernel,
        out_shape=jax.ShapeDtypeStruct((M_pad, N_pad), out_dtype),
        grid=grid,
        in_specs=[pl.BlockSpec((TM, N_pad), lambda i: (i, 0)),
                  pl.BlockSpec((1, N_pad), lambda i: (0, 0)),
                  pl.BlockSpec((1, N_pad), lambda i: (0, 0))],
        out_specs=pl.BlockSpec((TM, N_pad), lambda i: (i, 0)),
        compiler_params=_conv_compiler_params(),
        cost_estimate=cost,
    )(y_pad, scale, shift)


# ----------------------------------------------------------------------------
# JAX glue: im2col + weight reshaping
# ----------------------------------------------------------------------------
def im2col(x_nhwc, kh, kw, stride, pad):
    """x: [B,H,W,C] -> patches [B*OH*OW, kh*kw*C] with K ordered (kh, kw, ic)."""
    B, H, W, C = x_nhwc.shape
    xp = jnp.pad(x_nhwc, ((0, 0), (pad, pad), (pad, pad), (0, 0)))
    OH = (H + 2 * pad - kh) // stride + 1
    OW = (W + 2 * pad - kw) // stride + 1
    cols = []
    for i in range(kh):
        for j in range(kw):
            cols.append(xp[:, i:i + OH * stride:stride, j:j + OW * stride:stride, :])
    patches = jnp.stack(cols, axis=3)           # [B, OH, OW, kh*kw, C]
    return patches.reshape(B * OH * OW, kh * kw * C), OH, OW


def weight_to_mat(w_oihw):
    """PyTorch conv weight [OC, IC, KH, KW] -> [KH*KW*IC, OC] (matches im2col K)."""
    OC, IC, KH, KW = w_oihw.shape
    return jnp.transpose(w_oihw, (2, 3, 1, 0)).reshape(KH * KW * IC, OC)


# ----------------------------------------------------------------------------
# Parameters (deterministic, mirrors WGANDiscriminator._init_weights)
# ----------------------------------------------------------------------------
def init_params(key, in_channels, hidden_dim):
    ks = jax.random.split(key, 6)
    hd = hidden_dim
    w1 = 0.02 * jax.random.normal(ks[0], (hd, in_channels, 4, 4), jnp.float32)
    w2 = 0.02 * jax.random.normal(ks[1], (2 * hd, hd, 4, 4), jnp.float32)
    w3 = 0.02 * jax.random.normal(ks[2], (4 * hd, 2 * hd, 4, 4), jnp.float32)
    w4 = 0.02 * jax.random.normal(ks[3], (1, 4 * hd, 4, 4), jnp.float32)
    g2 = 1.0 + 0.02 * jax.random.normal(ks[4], (2 * hd,), jnp.float32)
    b2 = jnp.zeros((2 * hd,), jnp.float32)
    g3 = 1.0 + 0.02 * jax.random.normal(ks[5], (4 * hd,), jnp.float32)
    b3 = jnp.zeros((4 * hd,), jnp.float32)
    return dict(w1=w1, w2=w2, w3=w3, w4=w4, g2=g2, b2=b2, g3=g3, b3=b3)


# ----------------------------------------------------------------------------
# Forward pass
# ----------------------------------------------------------------------------
def wgan_discriminator_forward(params, x_nchw):
    """x: [B, C, H, W] float32 -> critic scores (flattened, [B] for 32x32 inputs)."""
    B = x_nchw.shape[0]
    x = jnp.transpose(x_nchw, (0, 2, 3, 1)).astype(jnp.float32)   # NHWC

    # Layer 1: Conv(k4,s2,p1, bias=False) + LeakyReLU(0.2) fused; bf16 output
    # (it only feeds the next conv's bf16 MXU operand).
    p, oh, ow = im2col(x, 4, 4, 2, 1)
    y, M, N = conv_lrelu(p, weight_to_mat(params["w1"]),
                         apply_lrelu=True, out_dtype=jnp.bfloat16)
    x = y[:M, :N].reshape(B, oh, ow, N)

    # Layer 2: Conv + BatchNorm2d + LeakyReLU.
    # TODO(synk): BatchNorm follows PyTorch *training-mode* semantics (fresh module
    # defaults to train(): batch stats, biased var, eps=1e-5); running stats for
    # eval() are not modeled.
    p, oh, ow = im2col(x, 4, 4, 2, 1)
    y, stats, M, N = conv_stats(p, weight_to_mat(params["w2"]))
    y = bn_lrelu(y, stats, params["g2"], params["b2"], M)
    x = y[:M, :N].reshape(B, oh, ow, N)

    # Layer 3: Conv + BatchNorm2d + LeakyReLU (same structure).
    p, oh, ow = im2col(x, 4, 4, 2, 1)
    y, stats, M, N = conv_stats(p, weight_to_mat(params["w3"]))
    y = bn_lrelu(y, stats, params["g3"], params["b3"], M)
    x = y[:M, :N].reshape(B, oh, ow, N)

    # Layer 4: Conv(k4,s1,p0, bias=False) -> view(-1).  N=1 output lane and M=B:
    # a Pallas kernel here is pure overhead (masked 1-lane stores), so per the
    # perf review it is a plain XLA matmul with f32 accumulation.
    p, _, _ = im2col(x, 4, 4, 1, 0)
    w4 = weight_to_mat(params["w4"]).astype(jnp.float32)
    y4 = jnp.dot(p.astype(jnp.float32), w4, preferred_element_type=jnp.float32)
    return y4.reshape(-1)


if __name__ == "__main__":
    key = jax.random.PRNGKey(0)
    k_param, k_x = jax.random.split(key)

    in_channels = 1
    hidden_dim = 16           # small stand-in for default 64
    B, H, W = 2, 32, 32       # 32x32 so the final 4x4 conv reduces to 1x1

    params = init_params(k_param, in_channels, hidden_dim)
    x = jax.random.normal(k_x, (B, in_channels, H, W), jnp.float32)

    scores = jax.jit(wgan_discriminator_forward)(params, x)
    scores = jax.block_until_ready(scores)
    assert scores.shape == (B,), scores.shape
    print("KERNEL_OK")
</pallas_src>

<mosaic_0001>
module attributes {stable_mosaic.version = 11 : i64} {
  func.func @_conv_kernel(%arg0: i32, %arg1: memref<512x16xbf16, #tpu.memory_space<vmem>>, %arg2: memref<16x128xbf16, #tpu.memory_space<vmem>>, %arg3: memref<512x128xbf16, #tpu.memory_space<vmem>>) attributes {dimension_semantics = [#tpu.dimension_semantics<parallel>], iteration_bounds = array<i64: 1>, scalar_prefetch = 0 : i64, scratch_operands = 0 : i64, tpu.core_type = #tpu.core_type<tc>, window_params = [{transform_indices = @transform_0, window_bounds = array<i64: 512, 16>}, {pipeline_mode = #tpu.pipeline_mode<synchronous>, transform_indices = @transform_1, window_bounds = array<i64: 16, 128>}, {transform_indices = @transform_2, window_bounds = array<i64: 512, 128>}]} {
    %c0 = arith.constant 0 : index
    %c0_0 = arith.constant 0 : index
    %0 = vector.load %arg1[%c0, %c0_0] : memref<512x16xbf16, #tpu.memory_space<vmem>>, vector<512x16xbf16>
    %c0_1 = arith.constant 0 : index
    %c0_2 = arith.constant 0 : index
    %1 = vector.load %arg2[%c0_1, %c0_2] : memref<16x128xbf16, #tpu.memory_space<vmem>>, vector<16x128xbf16>
    %cst = arith.constant dense<0.000000e+00> : vector<512x128xf32>
    %2 = tpu.matmul %0, %1, %cst {dimension_numbers = #tpu.dot_dimension_numbers<[1], [0], [0], [1], [0, 0, 1, 1], [], []>} : vector<512x16xbf16>, vector<16x128xbf16>, vector<512x128xf32> -> vector<512x128xf32>
    %cst_3 = arith.constant 0.000000e+00 : f32
    %3 = vector.broadcast %cst_3 : f32 to vector<512x128xf32>
    %4 = arith.cmpf oge, %2, %3 : vector<512x128xf32>
    %cst_4 = arith.constant 2.000000e-01 : f32
    %5 = vector.broadcast %cst_4 : f32 to vector<512x128xf32>
    %6 = arith.mulf %5, %2 : vector<512x128xf32>
    %7 = arith.select %4, %2, %6 : vector<512x128xi1>, vector<512x128xf32>
    %8 = arith.truncf %7 : vector<512x128xf32> to vector<512x128xbf16>
    %c0_5 = arith.constant 0 : index
    %c0_6 = arith.constant 0 : index
    %9 = vector.load %arg3[%c0_5, %c0_6] : memref<512x128xbf16, #tpu.memory_space<vmem>>, vector<512x128xbf16>
    tpu.vector_store %arg3[%c0_5, %c0_6], %8 {strides = array<i32>} : memref<512x128xbf16, #tpu.memory_space<vmem>>, vector<512x128xbf16>,
    return
  }
  func.func @transform_0(%arg0: i32) -> (i32, i32) {
    %c0_i32 = arith.constant 0 : i32
    %c0_i32_0 = arith.constant 0 : i32
    return %arg0, %c0_i32 : i32, i32
  }
  func.func @transform_1(%arg0: i32) -> (i32, i32) {
    %c0_i32 = arith.constant 0 : i32
    %c0_i32_0 = arith.constant 0 : i32
    %c0_i32_1 = arith.constant 0 : i32
    return %c0_i32, %c0_i32_0 : i32, i32
  }
  func.func @transform_2(%arg0: i32) -> (i32, i32) {
    %c0_i32 = arith.constant 0 : i32
    %c0_i32_0 = arith.constant 0 : i32
    return %arg0, %c0_i32 : i32, i32
  }
}

module attributes {stable_mosaic.version = 11 : i64} {
  func.func @_bn_lrelu_kernel(%arg0: i32, %arg1: memref<128x128xf32, #tpu.memory_space<vmem>>, %arg2: memref<1x128xf32, #tpu.memory_space<vmem>>, %arg3: memref<1x128xf32, #tpu.memory_space<vmem>>, %arg4: memref<128x128xbf16, #tpu.memory_space<vmem>>) attributes {dimension_semantics = [#tpu.dimension_semantics<parallel>], iteration_bounds = array<i64: 1>, scalar_prefetch = 0 : i64, scratch_operands = 0 : i64, tpu.core_type = #tpu.core_type<tc>, window_params = [{transform_indices = @transform_0, window_bounds = array<i64: 128, 128>}, {pipeline_mode = #tpu.pipeline_mode<synchronous>, transform_indices = @transform_1, window_bounds = array<i64: 1, 128>}, {pipeline_mode = #tpu.pipeline_mode<synchronous>, transform_indices = @transform_2, window_bounds = array<i64: 1, 128>}, {transform_indices = @transform_3, window_bounds = array<i64: 128, 128>}]} {
    %c0 = arith.constant 0 : index
    %c0_0 = arith.constant 0 : index
    %0 = vector.load %arg1[%c0, %c0_0] : memref<128x128xf32, #tpu.memory_space<vmem>>, vector<128x128xf32>
    %c0_1 = arith.constant 0 : index
    %c0_2 = arith.constant 0 : index
    %1 = vector.load %arg2[%c0_1, %c0_2] : memref<1x128xf32, #tpu.memory_space<vmem>>, vector<1x128xf32>
    %2 = vector.broadcast %1 : vector<1x128xf32> to vector<128x128xf32>
    %3 = arith.mulf %0, %2 : vector<128x128xf32>
    %c0_3 = arith.constant 0 : index
    %c0_4 = arith.constant 0 : index
    %4 = vector.load %arg3[%c0_3, %c0_4] : memref<1x128xf32, #tpu.memory_space<vmem>>, vector<1x128xf32>
    %5 = vector.broadcast %4 : vector<1x128xf32> to vector<128x128xf32>
    %6 = arith.addf %3, %5 : vector<128x128xf32>
    %cst = arith.constant 0.000000e+00 : f32
    %7 = vector.broadcast %cst : f32 to vector<128x128xf32>
    %8 = arith.cmpf oge, %6, %7 : vector<128x128xf32>
    %cst_5 = arith.constant 2.000000e-01 : f32
    %9 = vector.broadcast %cst_5 : f32 to vector<128x128xf32>
    %10 = arith.mulf %9, %6 : vector<128x128xf32>
    %11 = arith.select %8, %6, %10 : vector<128x128xi1>, vector<128x128xf32>
    %12 = arith.truncf %11 : vector<128x128xf32> to vector<128x128xbf16>
    %c0_6 = arith.constant 0 : index
    %c0_7 = arith.constant 0 : index
    %13 = vector.load %arg4[%c0_6, %c0_7] : memref<128x128xbf16, #tpu.memory_space<vmem>>, vector<128x128xbf16>
    tpu.vector_store %arg4[%c0_6, %c0_7], %12 {strides = array<i32>} : memref<128x128xbf16, #tpu.memory_space<vmem>>, vector<128x128xbf16>,
    return
  }
  func.func @transform_0(%arg0: i32) -> (i32, i32) {
    %c0_i32 = arith.constant 0 : i32
    %c0_i32_0 = arith.constant 0 : i32
    return %arg0, %c0_i32 : i32, i32
  }
  func.func @transform_1(%arg0: i32) -> (i32, i32) {
    %c0_i32 = arith.constant 0 : i32
    %c0_i32_0 = arith.constant 0 : i32
    %c0_i32_1 = arith.constant 0 : i32
    return %c0_i32, %c0_i32_0 : i32, i32
  }
  func.func @transform_2(%arg0: i32) -> (i32, i32) {
    %c0_i32 = arith.constant 0 : i32
    %c0_i32_0 = arith.constant 0 : i32
    %c0_i32_1 = arith.constant 0 : i32
    return %c0_i32, %c0_i32_0 : i32, i32
  }
  func.func @transform_3(%arg0: i32) -> (i32, i32) {
    %c0_i32 = arith.constant 0 : i32
    %c0_i32_0 = arith.constant 0 : i32
    return %arg0, %c0_i32 : i32, i32
  }
}

module attributes {stable_mosaic.version = 11 : i64} {
  func.func @_conv_stats_kernel(%arg0: i32, %arg1: memref<128x256xbf16, #tpu.memory_space<vmem>>, %arg2: memref<256x128xbf16, #tpu.memory_space<vmem>>, %arg3: memref<128x128xf32, #tpu.memory_space<vmem>>, %arg4: memref<1x2x128xf32, #tpu.memory_space<vmem>>) attributes {dimension_semantics = [#tpu.dimension_semantics<parallel>], iteration_bounds = array<i64: 1>, scalar_prefetch = 0 : i64, scratch_operands = 0 : i64, tpu.core_type = #tpu.core_type<tc>, window_params = [{transform_indices = @transform_0, window_bounds = array<i64: 128, 256>}, {pipeline_mode = #tpu.pipeline_mode<synchronous>, transform_indices = @transform_1, window_bounds = array<i64: 256, 128>}, {transform_indices = @transform_2, window_bounds = array<i64: 128, 128>}, {transform_indices = @transform_3, window_bounds = array<i64: 1, 2, 128>}]} {
    %c0 = arith.constant 0 : index
    %c0_0 = arith.constant 0 : index
    %0 = vector.load %arg1[%c0, %c0_0] : memref<128x256xbf16, #tpu.memory_space<vmem>>, vector<128x256xbf16>
    %c0_1 = arith.constant 0 : index
    %c0_2 = arith.constant 0 : index
    %1 = vector.load %arg2[%c0_1, %c0_2] : memref<256x128xbf16, #tpu.memory_space<vmem>>, vector<256x128xbf16>
    %cst = arith.constant dense<0.000000e+00> : vector<128x128xf32>
    %2 = tpu.matmul %0, %1, %cst {dimension_numbers = #tpu.dot_dimension_numbers<[1], [0], [0], [1], [0, 0, 1, 1], [], []>} : vector<128x256xbf16>, vector<256x128xbf16>, vector<128x128xf32> -> vector<128x128xf32>
    %c0_3 = arith.constant 0 : index
    %c0_4 = arith.constant 0 : index
    %3 = vector.load %arg3[%c0_3, %c0_4] : memref<128x128xf32, #tpu.memory_space<vmem>>, vector<128x128xf32>
    tpu.vector_store %arg3[%c0_3, %c0_4], %2 {strides = array<i32>} : memref<128x128xf32, #tpu.memory_space<vmem>>, vector<128x128xf32>,
    %cst_5 = arith.constant dense<0.000000e+00> : vector<128xf32>
    %4 = vector.multi_reduction <add>, %2, %cst_5 [0] : vector<128x128xf32> to vector<128xf32>
    %5 = vector.shape_cast %4 : vector<128xf32> to vector<1x128xf32>
    %6 = arith.mulf %2, %2 : vector<128x128xf32>
    %cst_6 = arith.constant dense<0.000000e+00> : vector<128xf32>
    %7 = vector.multi_reduction <add>, %6, %cst_6 [0] : vector<128x128xf32> to vector<128xf32>
    %8 = vector.shape_cast %7 : vector<128xf32> to vector<1x128xf32>
    %9 = tpu.concatenate %5, %8 in 0 : vector<1x128xf32>, vector<1x128xf32> -> vector<2x128xf32>
    %10 = vector.shape_cast %9 : vector<2x128xf32> to vector<1x2x128xf32>
    %c0_7 = arith.constant 0 : index
    %c0_8 = arith.constant 0 : index
    %c0_9 = arith.constant 0 : index
    %11 = vector.load %arg4[%c0_7, %c0_8, %c0_9] : memref<1x2x128xf32, #tpu.memory_space<vmem>>, vector<1x2x128xf32>
    tpu.vector_store %arg4[%c0_7, %c0_8, %c0_9], %10 {strides = array<i32>} : memref<1x2x128xf32, #tpu.memory_space<vmem>>, vector<1x2x128xf32>,
    return
  }
  func.func @transform_0(%arg0: i32) -> (i32, i32) {
    %c0_i32 = arith.constant 0 : i32
    %c0_i32_0 = arith.constant 0 : i32
    return %arg0, %c0_i32 : i32, i32
  }
  func.func @transform_1(%arg0: i32) -> (i32, i32) {
    %c0_i32 = arith.constant 0 : i32
    %c0_i32_0 = arith.constant 0 : i32
    %c0_i32_1 = arith.constant 0 : i32
    return %c0_i32, %c0_i32_0 : i32, i32
  }
  func.func @transform_2(%arg0: i32) -> (i32, i32) {
    %c0_i32 = arith.constant 0 : i32
    %c0_i32_0 = arith.constant 0 : i32
    return %arg0, %c0_i32 : i32, i32
  }
  func.func @transform_3(%arg0: i32) -> (i32, i32, i32) {
    %c0_i32 = arith.constant 0 : i32
    %c0_i32_0 = arith.constant 0 : i32
    %c0_i32_1 = arith.constant 0 : i32
    return %arg0, %c0_i32, %c0_i32_0 : i32, i32, i32
  }
}

module attributes {stable_mosaic.version = 11 : i64} {
  func.func @_conv_stats_kernel(%arg0: i32, %arg1: memref<32x512xbf16, #tpu.memory_space<vmem>>, %arg2: memref<512x128xbf16, #tpu.memory_space<vmem>>, %arg3: memref<32x128xf32, #tpu.memory_space<vmem>>, %arg4: memref<1x2x128xf32, #tpu.memory_space<vmem>>) attributes {dimension_semantics = [#tpu.dimension_semantics<parallel>], iteration_bounds = array<i64: 1>, scalar_prefetch = 0 : i64, scratch_operands = 0 : i64, tpu.core_type = #tpu.core_type<tc>, window_params = [{transform_indices = @transform_0, window_bounds = array<i64: 32, 512>}, {pipeline_mode = #tpu.pipeline_mode<synchronous>, transform_indices = @transform_1, window_bounds = array<i64: 512, 128>}, {transform_indices = @transform_2, window_bounds = array<i64: 32, 128>}, {transform_indices = @transform_3, window_bounds = array<i64: 1, 2, 128>}]} {
    %c0 = arith.constant 0 : index
    %c0_0 = arith.constant 0 : index
    %0 = vector.load %arg1[%c0, %c0_0] : memref<32x512xbf16, #tpu.memory_space<vmem>>, vector<32x512xbf16>
    %c0_1 = arith.constant 0 : index
    %c0_2 = arith.constant 0 : index
    %1 = vector.load %arg2[%c0_1, %c0_2] : memref<512x128xbf16, #tpu.memory_space<vmem>>, vector<512x128xbf16>
    %cst = arith.constant dense<0.000000e+00> : vector<32x128xf32>
    %2 = tpu.matmul %0, %1, %cst {dimension_numbers = #tpu.dot_dimension_numbers<[1], [0], [0], [1], [0, 0, 1, 1], [], []>} : vector<32x512xbf16>, vector<512x128xbf16>, vector<32x128xf32> -> vector<32x128xf32>
    %c0_3 = arith.constant 0 : index
    %c0_4 = arith.constant 0 : index
    %3 = vector.load %arg3[%c0_3, %c0_4] : memref<32x128xf32, #tpu.memory_space<vmem>>, vector<32x128xf32>
    tpu.vector_store %arg3[%c0_3, %c0_4], %2 {strides = array<i32>} : memref<32x128xf32, #tpu.memory_space<vmem>>, vector<32x128xf32>,
    %cst_5 = arith.constant dense<0.000000e+00> : vector<128xf32>
    %4 = vector.multi_reduction <add>, %2, %cst_5 [0] : vector<32x128xf32> to vector<128xf32>
    %5 = vector.shape_cast %4 : vector<128xf32> to vector<1x128xf32>
    %6 = arith.mulf %2, %2 : vector<32x128xf32>
    %cst_6 = arith.constant dense<0.000000e+00> : vector<128xf32>
    %7 = vector.multi_reduction <add>, %6, %cst_6 [0] : vector<32x128xf32> to vector<128xf32>
    %8 = vector.shape_cast %7 : vector<128xf32> to vector<1x128xf32>
    %9 = tpu.concatenate %5, %8 in 0 : vector<1x128xf32>, vector<1x128xf32> -> vector<2x128xf32>
    %10 = vector.shape_cast %9 : vector<2x128xf32> to vector<1x2x128xf32>
    %c0_7 = arith.constant 0 : index
    %c0_8 = arith.constant 0 : index
    %c0_9 = arith.constant 0 : index
    %11 = vector.load %arg4[%c0_7, %c0_8, %c0_9] : memref<1x2x128xf32, #tpu.memory_space<vmem>>, vector<1x2x128xf32>
    tpu.vector_store %arg4[%c0_7, %c0_8, %c0_9], %10 {strides = array<i32>} : memref<1x2x128xf32, #tpu.memory_space<vmem>>, vector<1x2x128xf32>,
    return
  }
  func.func @transform_0(%arg0: i32) -> (i32, i32) {
    %c0_i32 = arith.constant 0 : i32
    %c0_i32_0 = arith.constant 0 : i32
    return %arg0, %c0_i32 : i32, i32
  }
  func.func @transform_1(%arg0: i32) -> (i32, i32) {
    %c0_i32 = arith.constant 0 : i32
    %c0_i32_0 = arith.constant 0 : i32
    %c0_i32_1 = arith.constant 0 : i32
    return %c0_i32, %c0_i32_0 : i32, i32
  }
  func.func @transform_2(%arg0: i32) -> (i32, i32) {
    %c0_i32 = arith.constant 0 : i32
    %c0_i32_0 = arith.constant 0 : i32
    return %arg0, %c0_i32 : i32, i32
  }
  func.func @transform_3(%arg0: i32) -> (i32, i32, i32) {
    %c0_i32 = arith.constant 0 : i32
    %c0_i32_0 = arith.constant 0 : i32
    %c0_i32_1 = arith.constant 0 : i32
    return %arg0, %c0_i32, %c0_i32_0 : i32, i32, i32
  }
}

module attributes {stable_mosaic.version = 11 : i64} {
  func.func @_bn_lrelu_kernel(%arg0: i32, %arg1: memref<32x128xf32, #tpu.memory_space<vmem>>, %arg2: memref<1x128xf32, #tpu.memory_space<vmem>>, %arg3: memref<1x128xf32, #tpu.memory_space<vmem>>, %arg4: memref<32x128xbf16, #tpu.memory_space<vmem>>) attributes {dimension_semantics = [#tpu.dimension_semantics<parallel>], iteration_bounds = array<i64: 1>, scalar_prefetch = 0 : i64, scratch_operands = 0 : i64, tpu.core_type = #tpu.core_type<tc>, window_params = [{transform_indices = @transform_0, window_bounds = array<i64: 32, 128>}, {pipeline_mode = #tpu.pipeline_mode<synchronous>, transform_indices = @transform_1, window_bounds = array<i64: 1, 128>}, {pipeline_mode = #tpu.pipeline_mode<synchronous>, transform_indices = @transform_2, window_bounds = array<i64: 1, 128>}, {transform_indices = @transform_3, window_bounds = array<i64: 32, 128>}]} {
    %c0 = arith.constant 0 : index
    %c0_0 = arith.constant 0 : index
    %0 = vector.load %arg1[%c0, %c0_0] : memref<32x128xf32, #tpu.memory_space<vmem>>, vector<32x128xf32>
    %c0_1 = arith.constant 0 : index
    %c0_2 = arith.constant 0 : index
    %1 = vector.load %arg2[%c0_1, %c0_2] : memref<1x128xf32, #tpu.memory_space<vmem>>, vector<1x128xf32>
    %2 = vector.broadcast %1 : vector<1x128xf32> to vector<32x128xf32>
    %3 = arith.mulf %0, %2 : vector<32x128xf32>
    %c0_3 = arith.constant 0 : index
    %c0_4 = arith.constant 0 : index
    %4 = vector.load %arg3[%c0_3, %c0_4] : memref<1x128xf32, #tpu.memory_space<vmem>>, vector<1x128xf32>
    %5 = vector.broadcast %4 : vector<1x128xf32> to vector<32x128xf32>
    %6 = arith.addf %3, %5 : vector<32x128xf32>
    %cst = arith.constant 0.000000e+00 : f32
    %7 = vector.broadcast %cst : f32 to vector<32x128xf32>
    %8 = arith.cmpf oge, %6, %7 : vector<32x128xf32>
    %cst_5 = arith.constant 2.000000e-01 : f32
    %9 = vector.broadcast %cst_5 : f32 to vector<32x128xf32>
    %10 = arith.mulf %9, %6 : vector<32x128xf32>
    %11 = arith.select %8, %6, %10 : vector<32x128xi1>, vector<32x128xf32>
    %12 = arith.truncf %11 : vector<32x128xf32> to vector<32x128xbf16>
    %c0_6 = arith.constant 0 : index
    %c0_7 = arith.constant 0 : index
    %13 = vector.load %arg4[%c0_6, %c0_7] : memref<32x128xbf16, #tpu.memory_space<vmem>>, vector<32x128xbf16>
    tpu.vector_store %arg4[%c0_6, %c0_7], %12 {strides = array<i32>} : memref<32x128xbf16, #tpu.memory_space<vmem>>, vector<32x128xbf16>,
    return
  }
  func.func @transform_0(%arg0: i32) -> (i32, i32) {
    %c0_i32 = arith.constant 0 : i32
    %c0_i32_0 = arith.constant 0 : i32
    return %arg0, %c0_i32 : i32, i32
  }
  func.func @transform_1(%arg0: i32) -> (i32, i32) {
    %c0_i32 = arith.constant 0 : i32
    %c0_i32_0 = arith.constant 0 : i32
    %c0_i32_1 = arith.constant 0 : i32
    return %c0_i32, %c0_i32_0 : i32, i32
  }
  func.func @transform_2(%arg0: i32) -> (i32, i32) {
    %c0_i32 = arith.constant 0 : i32
    %c0_i32_0 = arith.constant 0 : i32
    %c0_i32_1 = arith.constant 0 : i32
    return %c0_i32, %c0_i32_0 : i32, i32
  }
  func.func @transform_3(%arg0: i32) -> (i32, i32) {
    %c0_i32 = arith.constant 0 : i32
    %c0_i32_0 = arith.constant 0 : i32
    return %arg0, %c0_i32 : i32, i32
  }
}

</mosaic_0001>

<bundles_post_ra>
// kernel: wgan_discriminator_forward.5
= control target key start
LH: loop header
LB: loop body
LE: loop exit
PB: predicated region body
PF: predicated region fallthrough
CT: control target
= control target key end

     0   :  { %vm244_vm0 = vcmask 130048   ;;  %s1913_s1 = inlined_call_operand.vmem [shape: bf16[16,128], index: 1, kind: input, shape index: {}]   ;;  %s1914_s0 = inlined_call_operand.vmem [shape: bf16[512,16], index: 0, kind: input, shape index: {}]   ;;  %s1915_s2 = inlined_call_operand.vmem [shape: bf16[512,128], index: 2, kind: output, shape index: {}]  }
   0x1   :  { %v1631_v0 = vld [vmem:[%s1913_s1] sm:$0xff]   ;;  %v1634_v3 = vld [vmem:[%s1914_s0 + $0x8] sm:$0xff]   ;;  %v1636_v5 = vld [vmem:[%s1914_s0 + $0x10] sm:$0xff]  }
   0x2   :  { %v1632_v1 = vld [vmem:[%s1914_s0] sm:$0xff]   ;;  %1563 = vmatprep.subr.bf16.mxu0 %v1631_v0  ;;  %1629 = vmatprep.subr.bf16.mxu1 %v1631_v0  ;;  %v1635_v4 = vld [vmem:[%s1914_s0 + $0x88] sm:$0xff]   ;;  %v1637_v6 = vld [vmem:[%s1914_s0 + $0x90] sm:$0xff]  }
   0x3   :  { %v1633_v2 = vld [vmem:[%s1914_s0 + $0x80] sm:$0xff]   ;;  %1564 = vmatpush3.bf16.msra.mxu0 %v1631_v0  ;;  %1630 = vmatpush3.bf16.msra.mxu1 %v1631_v0  ;;  %v1638_v7 = vld [vmem:[%s1914_s0 + $0x18] sm:$0xff]   ;;  %v1642_v11 = vld [vmem:[%s1914_s0 + $0x28] sm:$0xff]  }
   0x4   :  { %1565 = vmatprep.mubr.msk.bf16.mxu0 %vm244_vm0, %v1632_v1  ;;  %1597 = vmatprep.mubr.msk.bf16.mxu1 %vm244_vm0, %v1633_v2  ;;  %v1639_v8 = vld [vmem:[%s1914_s0 + $0x98] sm:$0xff]   ;;  %v1640_v9 = vld [vmem:[%s1914_s0 + $0x20] sm:$0xff]   ;;  %v1643_v12 = vld [vmem:[%s1914_s0 + $0xa8] sm:$0xff]  }
   0x5   :  { %v1641_v10 = vld [vmem:[%s1914_s0 + $0xa0] sm:$0xff]   ;;  %v1644_v13 = vld [vmem:[%s1914_s0 + $0x30] sm:$0xff]   ;;  %v1646_v15 = vld [vmem:[%s1914_s0 + $0x38] sm:$0xff]  }
   0x6   :  { %1566 = vmatmul.mubr.msk.bf16.vlgmr.msra.gmra.mrb[0].mxu0 %vm244_vm0, %v1634_v3  ;;  %1598 = vmatmul.mubr.msk.bf16.vlgmr.msra.gmra.mrb[0].mxu1 %vm244_vm0, %v1635_v4  ;;  %v1645_v14 = vld [vmem:[%s1914_s0 + $0xb0] sm:$0xff]   ;;  %v1647_v16 = vld [vmem:[%s1914_s0 + $0xb8] sm:$0xff]   ;;  %v1648_v17 = vld [vmem:[%s1914_s0 + $0x40] sm:$0xff]  }
   0x7   :  { %1569 = vmatprep.mubr.msk.bf16.mxu0 %vm244_vm0, %v1636_v5  ;;  %1601 = vmatprep.mubr.msk.bf16.mxu1 %vm244_vm0, %v1637_v6  ;;  %v1649_v18 = vld [vmem:[%s1914_s0 + $0xc0] sm:$0xff]   ;;  %v1650_v19 = vld [vmem:[%s1914_s0 + $0x48] sm:$0xff]   ;;  %v1652_v21 = vld [vmem:[%s1914_s0 + $0x50] sm:$0xff]  }
   0x8   :  { %v1651_v20 = vld [vmem:[%s1914_s0 + $0xc8] sm:$0xff]   ;;  %v1653_v22 = vld [vmem:[%s1914_s0 + $0xd0] sm:$0xff]   ;;  %v1654_v23 = vld [vmem:[%s1914_s0 + $0x58] sm:$0xff]  }
   0x9   :  { %v1655_v24 = vld [vmem:[%s1914_s0 + $0xd8] sm:$0xff]   ;;  %v1656_v25 = vld [vmem:[%s1914_s0 + $0x60] sm:$0xff]   ;;  %v1658_v27 = vld [vmem:[%s1914_s0 + $0x68] sm:$0xff]  }
   0xa   :  { %v1657_v26 = vld [vmem:[%s1914_s0 + $0xe0] sm:$0xff]   ;;  %v1659_v28 = vld [vmem:[%s1914_s0 + $0xe8] sm:$0xff]   ;;  %v1660_v29 = vld [vmem:[%s1914_s0 + $0x70] sm:$0xff]  }
   0xb   :  { %v1661_v30 = vld [vmem:[%s1914_s0 + $0xf0] sm:$0xff]   ;;  %v1662_v31 = vld [vmem:[%s1914_s0 + $0x78] sm:$0xff]  }
   0xc   :  { %v1663_v32 = vld [vmem:[%s1914_s0 + $0xf8] sm:$0xff]  }
   0xe   :  { %1570 = vmatmul.mubr.msk.bf16.gmra.mrb[4].mxu0 %vm244_vm0, %v1638_v7  ;;  %1602 = vmatmul.mubr.msk.bf16.gmra.mrb[4].mxu1 %vm244_vm0, %v1639_v8 }
   0xf   :  { %1573 = vmatprep.mubr.msk.bf16.mxu0 %vm244_vm0, %v1640_v9  ;;  %1605 = vmatprep.mubr.msk.bf16.mxu1 %vm244_vm0, %v1641_v10 }
  0x16   :  { %1574 = vmatmul.mubr.msk.bf16.gmra.mrb[8].mxu0 %vm244_vm0, %v1642_v11  ;;  %1606 = vmatmul.mubr.msk.bf16.gmra.mrb[8].mxu1 %vm244_vm0, %v1643_v12 }
  0x17   :  { %1577 = vmatprep.mubr.msk.bf16.mxu0 %vm244_vm0, %v1644_v13  ;;  %1609 = vmatprep.mubr.msk.bf16.mxu1 %vm244_vm0, %v1645_v14 }
  0x1e   :  { %1578 = vmatmul.mubr.msk.bf16.gmra.mrb[12].mxu0 %vm244_vm0, %v1646_v15  ;;  %1610 = vmatmul.mubr.msk.bf16.gmra.mrb[12].mxu1 %vm244_vm0, %v1647_v16 }
  0x1f   :  { %1581 = vmatprep.mubr.msk.bf16.mxu0 %vm244_vm0, %v1648_v17  ;;  %1613 = vmatprep.mubr.msk.bf16.mxu1 %vm244_vm0, %v1649_v18 }
  0x26   :  { %1582 = vmatmul.mubr.msk.bf16.gmra.mrb[16].mxu0 %vm244_vm0, %v1650_v19  ;;  %1614 = vmatmul.mubr.msk.bf16.gmra.mrb[16].mxu1 %vm244_vm0, %v1651_v20 }
  0x27   :  { %1585 = vmatprep.mubr.msk.bf16.mxu0 %vm244_vm0, %v1652_v21  ;;  %1617 = vmatprep.mubr.msk.bf16.mxu1 %vm244_vm0, %v1653_v22 }
  0x2e   :  { %1586 = vmatmul.mubr.msk.bf16.gmra.mrb[20].mxu0 %vm244_vm0, %v1654_v23  ;;  %1618 = vmatmul.mubr.msk.bf16.gmra.mrb[20].mxu1 %vm244_vm0, %v1655_v24 }
  0x2f   :  { %1589 = vmatprep.mubr.msk.bf16.mxu0 %vm244_vm0, %v1656_v25  ;;  %1621 = vmatprep.mubr.msk.bf16.mxu1 %vm244_vm0, %v1657_v26 }
  0x36   :  { %1590 = vmatmul.mubr.msk.bf16.gmra.mrb[24].mxu0 %vm244_vm0, %v1658_v27  ;;  %1622 = vmatmul.mubr.msk.bf16.gmra.mrb[24].mxu1 %vm244_vm0, %v1659_v28 }
  0x37   :  { %1593 = vmatprep.mubr.msk.bf16.mxu0 %vm244_vm0, %v1660_v29  ;;  %1625 = vmatprep.mubr.msk.bf16.mxu1 %vm244_vm0, %v1661_v30 }
  0x3e   :  { %1594 = vmatmul.mubr.msk.bf16.gmra.mrb[28].mxu0 %vm244_vm0, %v1662_v31  ;;  %1626 = vmatmul.mubr.msk.bf16.gmra.mrb[28].mxu1 %vm244_vm0, %v1663_v32 }
  0xd9   :  { %v1567_v33 = vpop.f32.mrb[0].mxu0  ;;  %v1599_v34 = vpop.f32.mrb[0].mxu1 }
  0xda   :  { %vm632_vm1 = vcmp.ge.f32.partialorder %v1567_v33, 0.0  ;;  %v696_v35 = vmul.f32 0.2, %v1567_v33  ;;  %v728_v36 = vmul.f32 0.2, %v1599_v34  ;;  %vm664_vm2 = vcmp.ge.f32.partialorder %v1599_v34, 0.0 }
  0xdb   :  { %v375_v37 = vpop.f32.mrb[1].mxu0  ;;  %v503_v38 = vpop.f32.mrb[1].mxu1 }
  0xdc   :  { %v694_v39 = vmul.f32 0.2, %v375_v37  ;;  %v1568_v40 = vpop.f32.mrb[2].mxu0  ;;  %v1600_v41 = vpop.f32.mrb[2].mxu1  ;;  %v760_v42 = vsel %vm632_vm1, %v1567_v33, %v696_v35  ;;  %v726_v43 = vmul.f32 0.2, %v503_v38  ;;  %v792_v45 = vsel %vm664_vm2, %v1599_v34, %v728_v36 }
  0xdd   :  { %vm633_vm3 = vcmp.ge.f32.partialorder %v1568_v40, 0.0  ;;  %v697_v44 = vmul.f32 0.2, %v1568_v40  ;;  %vm630_vm4 = vcmp.ge.f32.partialorder %v375_v37, 0.0  ;;  %vm665_vm5 = vcmp.ge.f32.partialorder %v1600_v41, 0.0  ;;  %v378_v47 = vpop.f32.mrb[3].mxu0 }
  0xde   :  { %v729_v46 = vmul.f32 0.2, %v1600_v41  ;;  %v506_v48 = vpop.f32.mrb[3].mxu1  ;;  %vm662_vm6 = vcmp.ge.f32.partialorder %v503_v38, 0.0  ;;  %vm631_vm7 = vcmp.ge.f32.partialorder %v378_v47, 0.0  ;;  %v758_v54 = vsel %vm630_vm4, %v375_v37, %v694_v39 }
  0xdf   :  { %v761_v49 = vsel %vm633_vm3, %v1568_v40, %v697_v44  ;;  %v695_v50 = vmul.f32 0.2, %v378_v47  ;;  %vm663_vm8 = vcmp.ge.f32.partialorder %v506_v48, 0.0  ;;  %v727_v53 = vmul.f32 0.2, %v506_v48 }
  0xe0   :  { %v1347_v51 = vpack.c.bf16 %v761_v49, %v760_v42  ;;  %v793_v52 = vsel %vm665_vm5, %v1600_v41, %v729_v46  ;;  %v790_v59 = vsel %vm662_vm6, %v503_v38, %v726_v43 }
  0xe1   :  { %v1427_v55 = vpack.c.bf16 %v793_v52, %v792_v45  ;;  %v759_v56 = vsel %vm631_vm7, %v378_v47, %v695_v50  ;;  %v1571_v57 = vpop.f32.mrb[4].mxu0  ;;  %v1603_v58 = vpop.f32.mrb[4].mxu1  ;;  %v791_v61 = vsel %vm663_vm8, %v506_v48, %v727_v53 }
  0xe2   :  { %1499 = vst [vmem:[%s1915_s2 + $0x8] sm:$0xff] %v1347_v51   ;;  %v1342_v60 = vpack.c.bf16 %v759_v56, %v758_v54  ;;  %v700_v62 = vmul.f32 0.2, %v1571_v57  ;;  %v391_v63 = vpop.f32.mrb[5].mxu0  ;;  %v519_v0 = vpop.f32.mrb[5].mxu1  ;;  %v1422_v1 = vpack.c.bf16 %v791_v61, %v790_v59  ;;  %vm636_vm9 = vcmp.ge.f32.partialorder %v1571_v57, 0.0 }
  0xe3   :  { %1515 = vst [vmem:[%s1915_s2 + $0x88] sm:$0xff] %v1427_v55   ;;  %v732_v2 = vmul.f32 0.2, %v1603_v58  ;;  %v1572_v3 = vpop.f32.mrb[6].mxu0  ;;  %v1604_v4 = vpop.f32.mrb[6].mxu1  ;;  %vm668_vm10 = vcmp.ge.f32.partialorder %v1603_v58, 0.0 }
  0xe4   :  { %1343 = vst [vmem:[%s1915_s2] sm:$0xff] %v1342_v60   ;;  %v698_v5 = vmul.f32 0.2, %v391_v63  ;;  %v730_v6 = vmul.f32 0.2, %v519_v0  ;;  %v394_v7 = vpop.f32.mrb[7].mxu0  ;;  %1514 = vst [vmem:[%s1915_s2 + $0x80] sm:$0xff] %v1422_v1   ;;  %v764_v10 = vsel %vm636_vm9, %v1571_v57, %v700_v62 }
  0xe5   :  { %vm634_vm11 = vcmp.ge.f32.partialorder %v391_v63, 0.0  ;;  %vm637_vm12 = vcmp.ge.f32.partialorder %v1572_v3, 0.0  ;;  %v701_v8 = vmul.f32 0.2, %v1572_v3  ;;  %vm669_vm13 = vcmp.ge.f32.partialorder %v1604_v4, 0.0  ;;  %v522_v9 = vpop.f32.mrb[7].mxu1 }
  0xe6   :  { %vm666_vm14 = vcmp.ge.f32.partialorder %v519_v0, 0.0  ;;  %v733_v11 = vmul.f32 0.2, %v1604_v4  ;;  %vm635_vm15 = vcmp.ge.f32.partialorder %v394_v7, 0.0  ;;  %v699_v13 = vmul.f32 0.2, %v394_v7 }
  0xe7   :  { %v765_v12 = vsel %vm637_vm12, %v1572_v3, %v701_v8  ;;  %vm667_vm0 = vcmp.ge.f32.partialorder %v522_v9, 0.0  ;;  %v731_v14 = vmul.f32 0.2, %v522_v9  ;;  %v796_v15 = vsel %vm668_vm10, %v1603_v58, %v732_v2 }
  0xe8   :  { %v762_v16 = vsel %vm634_vm11, %v391_v63, %v698_v5  ;;  %v1357_v17 = vpack.c.bf16 %v765_v12, %v764_v10  ;;  %v797_v18 = vsel %vm669_vm13, %v1604_v4, %v733_v11  ;;  %v794_v19 = vsel %vm666_vm14, %v519_v0, %v730_v6 }
  0xe9   :  { %v1437_v20 = vpack.c.bf16 %v797_v18, %v796_v15  ;;  %v763_v21 = vsel %vm635_vm15, %v394_v7, %v699_v13  ;;  %v795_v22 = vsel %vm667_vm0, %v522_v9, %v731_v14  ;;  %v1575_v23 = vpop.f32.mrb[8].mxu0  ;;  %v1607_v24 = vpop.f32.mrb[8].mxu1 }
  0xea   :  { %1501 = vst [vmem:[%s1915_s2 + $0x18] sm:$0xff] %v1357_v17   ;;  %v1352_v25 = vpack.c.bf16 %v763_v21, %v762_v16  ;;  %v1432_v26 = vpack.c.bf16 %v795_v22, %v794_v19  ;;  %vm640_vm1 = vcmp.ge.f32.partialorder %v1575_v23, 0.0  ;;  %v704_v27 = vmul.f32 0.2, %v1575_v23  ;;  %v407_v28 = vpop.f32.mrb[9].mxu0  ;;  %v535_v29 = vpop.f32.mrb[9].mxu1 }
  0xeb   :  { %1517 = vst [vmem:[%s1915_s2 + $0x98] sm:$0xff] %v1437_v20   ;;  %vm672_vm2 = vcmp.ge.f32.partialorder %v1607_v24, 0.0  ;;  %v736_v30 = vmul.f32 0.2, %v1607_v24  ;;  %v702_v31 = vmul.f32 0.2, %v407_v28 }
  0xec   :  { %1500 = vst [vmem:[%s1915_s2 + $0x10] sm:$0xff] %v1352_v25   ;;  %1516 = vst [vmem:[%s1915_s2 + $0x90] sm:$0xff] %v1432_v26   ;;  %v734_v32 = vmul.f32 0.2, %v535_v29  ;;  %v1576_v33 = vpop.f32.mrb[10].mxu0  ;;  %v1608_v34 = vpop.f32.mrb[10].mxu1  ;;  %v768_v35 = vsel %vm640_vm1, %v1575_v23, %v704_v27 }
  0xed   :  { %vm638_vm3 = vcmp.ge.f32.partialorder %v407_v28, 0.0  ;;  %vm641_vm4 = vcmp.ge.f32.partialorder %v1576_v33, 0.0  ;;  %v705_v36 = vmul.f32 0.2, %v1576_v33  ;;  %v410_v37 = vpop.f32.mrb[11].mxu0  ;;  %v538_v38 = vpop.f32.mrb[11].mxu1  ;;  %v800_v43 = vsel %vm672_vm2, %v1607_v24, %v736_v30 }
  0xee   :  { %vm670_vm5 = vcmp.ge.f32.partialorder %v535_v29, 0.0  ;;  %vm673_vm6 = vcmp.ge.f32.partialorder %v1608_v34, 0.0  ;;  %v737_v39 = vmul.f32 0.2, %v1608_v34  ;;  %vm639_vm7 = vcmp.ge.f32.partialorder %v410_v37, 0.0 }
  0xef   :  { %v769_v40 = vsel %vm641_vm4, %v1576_v33, %v705_v36  ;;  %v703_v41 = vmul.f32 0.2, %v410_v37  ;;  %vm671_vm8 = vcmp.ge.f32.partialorder %v538_v38, 0.0  ;;  %v735_v42 = vmul.f32 0.2, %v538_v38 }
  0xf0   :  { %v766_v44 = vsel %vm638_vm3, %v407_v28, %v702_v31  ;;  %v1367_v45 = vpack.c.bf16 %v769_v40, %v768_v35  ;;  %v801_v46 = vsel %vm673_vm6, %v1608_v34, %v737_v39  ;;  %v798_v47 = vsel %vm670_vm5, %v535_v29, %v734_v32 }
  0xf1   :  { %v1447_v48 = vpack.c.bf16 %v801_v46, %v800_v43  ;;  %v767_v49 = vsel %vm639_vm7, %v410_v37, %v703_v41  ;;  %v799_v50 = vsel %vm671_vm8, %v538_v38, %v735_v42  ;;  %v1579_v51 = vpop.f32.mrb[12].mxu0  ;;  %v1611_v52 = vpop.f32.mrb[12].mxu1 }
  0xf2   :  { %1503 = vst [vmem:[%s1915_s2 + $0x28] sm:$0xff] %v1367_v45   ;;  %v1362_v53 = vpack.c.bf16 %v767_v49, %v766_v44  ;;  %v1442_v54 = vpack.c.bf16 %v799_v50, %v798_v47  ;;  %vm644_vm9 = vcmp.ge.f32.partialorder %v1579_v51, 0.0  ;;  %v708_v55 = vmul.f32 0.2, %v1579_v51  ;;  %v423_v56 = vpop.f32.mrb[13].mxu0  ;;  %v551_v57 = vpop.f32.mrb[13].mxu1 }
  0xf3   :  { %1519 = vst [vmem:[%s1915_s2 + $0xa8] sm:$0xff] %v1447_v48   ;;  %vm676_vm10 = vcmp.ge.f32.partialorder %v1611_v52, 0.0  ;;  %v740_v58 = vmul.f32 0.2, %v1611_v52  ;;  %v706_v59 = vmul.f32 0.2, %v423_v56 }
  0xf4   :  { %1502 = vst [vmem:[%s1915_s2 + $0x20] sm:$0xff] %v1362_v53   ;;  %1518 = vst [vmem:[%s1915_s2 + $0xa0] sm:$0xff] %v1442_v54   ;;  %v738_v60 = vmul.f32 0.2, %v551_v57  ;;  %v1580_v61 = vpop.f32.mrb[14].mxu0  ;;  %v1612_v62 = vpop.f32.mrb[14].mxu1  ;;  %v772_v63 = vsel %vm644_vm9, %v1579_v51, %v708_v55 }
  0xf5   :  { %vm642_vm11 = vcmp.ge.f32.partialorder %v423_v56, 0.0  ;;  %vm645_vm12 = vcmp.ge.f32.partialorder %v1580_v61, 0.0  ;;  %v709_v0 = vmul.f32 0.2, %v1580_v61  ;;  %v426_v1 = vpop.f32.mrb[15].mxu0  ;;  %v554_v2 = vpop.f32.mrb[15].mxu1  ;;  %v804_v7 = vsel %vm676_vm10, %v1611_v52, %v740_v58 }
  0xf6   :  { %vm674_vm13 = vcmp.ge.f32.partialorder %v551_v57, 0.0  ;;  %vm677_vm14 = vcmp.ge.f32.partialorder %v1612_v62, 0.0  ;;  %v741_v3 = vmul.f32 0.2, %v1612_v62  ;;  %vm643_vm15 = vcmp.ge.f32.partialorder %v426_v1, 0.0 }
  0xf7   :  { %v773_v4 = vsel %vm645_vm12, %v1580_v61, %v709_v0  ;;  %v707_v5 = vmul.f32 0.2, %v426_v1  ;;  %vm675_vm0 = vcmp.ge.f32.partialorder %v554_v2, 0.0  ;;  %v739_v6 = vmul.f32 0.2, %v554_v2 }
  0xf8   :  { %v770_v8 = vsel %vm642_vm11, %v423_v56, %v706_v59  ;;  %v1377_v9 = vpack.c.bf16 %v773_v4, %v772_v63  ;;  %v805_v10 = vsel %vm677_vm14, %v1612_v62, %v741_v3  ;;  %v802_v11 = vsel %vm674_vm13, %v551_v57, %v738_v60 }
  0xf9   :  { %v1457_v12 = vpack.c.bf16 %v805_v10, %v804_v7  ;;  %v771_v13 = vsel %vm643_vm15, %v426_v1, %v707_v5  ;;  %v803_v14 = vsel %vm675_vm0, %v554_v2, %v739_v6  ;;  %v1583_v15 = vpop.f32.mrb[16].mxu0  ;;  %v1615_v16 = vpop.f32.mrb[16].mxu1 }
  0xfa   :  { %1505 = vst [vmem:[%s1915_s2 + $0x38] sm:$0xff] %v1377_v9   ;;  %v1372_v17 = vpack.c.bf16 %v771_v13, %v770_v8  ;;  %v1452_v18 = vpack.c.bf16 %v803_v14, %v802_v11  ;;  %vm648_vm1 = vcmp.ge.f32.partialorder %v1583_v15, 0.0  ;;  %v712_v19 = vmul.f32 0.2, %v1583_v15  ;;  %v439_v20 = vpop.f32.mrb[17].mxu0  ;;  %v567_v21 = vpop.f32.mrb[17].mxu1 }
  0xfb   :  { %1521 = vst [vmem:[%s1915_s2 + $0xb8] sm:$0xff] %v1457_v12   ;;  %vm680_vm2 = vcmp.ge.f32.partialorder %v1615_v16, 0.0  ;;  %v744_v22 = vmul.f32 0.2, %v1615_v16  ;;  %v710_v23 = vmul.f32 0.2, %v439_v20 }
  0xfc   :  { %1504 = vst [vmem:[%s1915_s2 + $0x30] sm:$0xff] %v1372_v17   ;;  %1520 = vst [vmem:[%s1915_s2 + $0xb0] sm:$0xff] %v1452_v18   ;;  %v742_v24 = vmul.f32 0.2, %v567_v21  ;;  %v1584_v25 = vpop.f32.mrb[18].mxu0  ;;  %v1616_v26 = vpop.f32.mrb[18].mxu1  ;;  %v776_v27 = vsel %vm648_vm1, %v1583_v15, %v712_v19 }
  0xfd   :  { %vm646_vm3 = vcmp.ge.f32.partialorder %v439_v20, 0.0  ;;  %vm649_vm4 = vcmp.ge.f32.partialorder %v1584_v25, 0.0  ;;  %v713_v28 = vmul.f32 0.2, %v1584_v25  ;;  %v442_v29 = vpop.f32.mrb[19].mxu0  ;;  %v570_v30 = vpop.f32.mrb[19].mxu1  ;;  %v808_v35 = vsel %vm680_vm2, %v1615_v16, %v744_v22 }
  0xfe   :  { %vm678_vm5 = vcmp.ge.f32.partialorder %v567_v21, 0.0  ;;  %vm681_vm6 = vcmp.ge.f32.partialorder %v1616_v26, 0.0  ;;  %v745_v31 = vmul.f32 0.2, %v1616_v26  ;;  %vm647_vm7 = vcmp.ge.f32.partialorder %v442_v29, 0.0 }
  0xff   :  { %v777_v32 = vsel %vm649_vm4, %v1584_v25, %v713_v28  ;;  %v711_v33 = vmul.f32 0.2, %v442_v29  ;;  %vm679_vm8 = vcmp.ge.f32.partialorder %v570_v30, 0.0  ;;  %v743_v34 = vmul.f32 0.2, %v570_v30 }
 0x100   :  { %v774_v36 = vsel %vm646_vm3, %v439_v20, %v710_v23  ;;  %v1387_v37 = vpack.c.bf16 %v777_v32, %v776_v27  ;;  %v809_v38 = vsel %vm681_vm6, %v1616_v26, %v745_v31  ;;  %v806_v39 = vsel %vm678_vm5, %v567_v21, %v742_v24 }
 0x101   :  { %v1467_v40 = vpack.c.bf16 %v809_v38, %v808_v35  ;;  %v775_v41 = vsel %vm647_vm7, %v442_v29, %v711_v33  ;;  %v807_v42 = vsel %vm679_vm8, %v570_v30, %v743_v34  ;;  %v1587_v43 = vpop.f32.mrb[20].mxu0  ;;  %v1619_v44 = vpop.f32.mrb[20].mxu1 }
 0x102   :  { %1507 = vst [vmem:[%s1915_s2 + $0x48] sm:$0xff] %v1387_v37   ;;  %v1382_v45 = vpack.c.bf16 %v775_v41, %v774_v36  ;;  %v1462_v46 = vpack.c.bf16 %v807_v42, %v806_v39  ;;  %vm652_vm9 = vcmp.ge.f32.partialorder %v1587_v43, 0.0  ;;  %v716_v47 = vmul.f32 0.2, %v1587_v43  ;;  %v455_v48 = vpop.f32.mrb[21].mxu0  ;;  %v583_v49 = vpop.f32.mrb[21].mxu1 }
 0x103   :  { %1523 = vst [vmem:[%s1915_s2 + $0xc8] sm:$0xff] %v1467_v40   ;;  %vm684_vm10 = vcmp.ge.f32.partialorder %v1619_v44, 0.0  ;;  %v748_v50 = vmul.f32 0.2, %v1619_v44  ;;  %v714_v51 = vmul.f32 0.2, %v455_v48 }
 0x104   :  { %1506 = vst [vmem:[%s1915_s2 + $0x40] sm:$0xff] %v1382_v45   ;;  %1522 = vst [vmem:[%s1915_s2 + $0xc0] sm:$0xff] %v1462_v46   ;;  %v746_v52 = vmul.f32 0.2, %v583_v49  ;;  %v1588_v53 = vpop.f32.mrb[22].mxu0  ;;  %v1620_v54 = vpop.f32.mrb[22].mxu1  ;;  %v780_v55 = vsel %vm652_vm9, %v1587_v43, %v716_v47 }
 0x105   :  { %vm650_vm11 = vcmp.ge.f32.partialorder %v455_v48, 0.0  ;;  %vm653_vm12 = vcmp.ge.f32.partialorder %v1588_v53, 0.0  ;;  %v717_v56 = vmul.f32 0.2, %v1588_v53  ;;  %v458_v57 = vpop.f32.mrb[23].mxu0  ;;  %v586_v58 = vpop.f32.mrb[23].mxu1  ;;  %v812_v63 = vsel %vm684_vm10, %v1619_v44, %v748_v50 }
 0x106   :  { %vm682_vm13 = vcmp.ge.f32.partialorder %v583_v49, 0.0  ;;  %vm685_vm14 = vcmp.ge.f32.partialorder %v1620_v54, 0.0  ;;  %v749_v59 = vmul.f32 0.2, %v1620_v54  ;;  %vm651_vm15 = vcmp.ge.f32.partialorder %v458_v57, 0.0 }
 0x107   :  { %v781_v60 = vsel %vm653_vm12, %v1588_v53, %v717_v56  ;;  %v715_v61 = vmul.f32 0.2, %v458_v57  ;;  %vm683_vm0 = vcmp.ge.f32.partialorder %v586_v58, 0.0  ;;  %v747_v62 = vmul.f32 0.2, %v586_v58 }
 0x108   :  { %v778_v0 = vsel %vm650_vm11, %v455_v48, %v714_v51  ;;  %v1397_v1 = vpack.c.bf16 %v781_v60, %v780_v55  ;;  %v813_v2 = vsel %vm685_vm14, %v1620_v54, %v749_v59  ;;  %v810_v3 = vsel %vm682_vm13, %v583_v49, %v746_v52 }
 0x109   :  { %v1477_v4 = vpack.c.bf16 %v813_v2, %v812_v63  ;;  %v779_v5 = vsel %vm651_vm15, %v458_v57, %v715_v61  ;;  %v811_v6 = vsel %vm683_vm0, %v586_v58, %v747_v62  ;;  %v1591_v7 = vpop.f32.mrb[24].mxu0  ;;  %v1623_v8 = vpop.f32.mrb[24].mxu1 }
 0x10a   :  { %1509 = vst [vmem:[%s1915_s2 + $0x58] sm:$0xff] %v1397_v1   ;;  %v1392_v9 = vpack.c.bf16 %v779_v5, %v778_v0  ;;  %v1472_v10 = vpack.c.bf16 %v811_v6, %v810_v3  ;;  %vm656_vm1 = vcmp.ge.f32.partialorder %v1591_v7, 0.0  ;;  %v720_v11 = vmul.f32 0.2, %v1591_v7  ;;  %v471_v12 = vpop.f32.mrb[25].mxu0  ;;  %v599_v13 = vpop.f32.mrb[25].mxu1 }
 0x10b   :  { %1525 = vst [vmem:[%s1915_s2 + $0xd8] sm:$0xff] %v1477_v4   ;;  %vm688_vm2 = vcmp.ge.f32.partialorder %v1623_v8, 0.0  ;;  %v752_v14 = vmul.f32 0.2, %v1623_v8  ;;  %v718_v15 = vmul.f32 0.2, %v471_v12 }
 0x10c   :  { %1508 = vst [vmem:[%s1915_s2 + $0x50] sm:$0xff] %v1392_v9   ;;  %1524 = vst [vmem:[%s1915_s2 + $0xd0] sm:$0xff] %v1472_v10   ;;  %v750_v16 = vmul.f32 0.2, %v599_v13  ;;  %v1592_v17 = vpop.f32.mrb[26].mxu0  ;;  %v1624_v18 = vpop.f32.mrb[26].mxu1  ;;  %v784_v19 = vsel %vm656_vm1, %v1591_v7, %v720_v11 }
 0x10d   :  { %vm654_vm3 = vcmp.ge.f32.partialorder %v471_v12, 0.0  ;;  %vm657_vm4 = vcmp.ge.f32.partialorder %v1592_v17, 0.0  ;;  %v721_v20 = vmul.f32 0.2, %v1592_v17  ;;  %v474_v21 = vpop.f32.mrb[27].mxu0  ;;  %v602_v22 = vpop.f32.mrb[27].mxu1  ;;  %v816_v27 = vsel %vm688_vm2, %v1623_v8, %v752_v14 }
 0x10e   :  { %vm686_vm5 = vcmp.ge.f32.partialorder %v599_v13, 0.0  ;;  %vm689_vm6 = vcmp.ge.f32.partialorder %v1624_v18, 0.0  ;;  %v753_v23 = vmul.f32 0.2, %v1624_v18  ;;  %vm655_vm7 = vcmp.ge.f32.partialorder %v474_v21, 0.0 }
 0x10f   :  { %v785_v24 = vsel %vm657_vm4, %v1592_v17, %v721_v20  ;;  %v719_v25 = vmul.f32 0.2, %v474_v21  ;;  %vm687_vm8 = vcmp.ge.f32.partialorder %v602_v22, 0.0  ;;  %v751_v26 = vmul.f32 0.2, %v602_v22 }
 0x110   :  { %v782_v28 = vsel %vm654_vm3, %v471_v12, %v718_v15  ;;  %v1407_v29 = vpack.c.bf16 %v785_v24, %v784_v19  ;;  %v817_v30 = vsel %vm689_vm6, %v1624_v18, %v753_v23  ;;  %v814_v31 = vsel %vm686_vm5, %v599_v13, %v750_v16 }
 0x111   :  { %v1487_v32 = vpack.c.bf16 %v817_v30, %v816_v27  ;;  %v783_v33 = vsel %vm655_vm7, %v474_v21, %v719_v25  ;;  %v815_v34 = vsel %vm687_vm8, %v602_v22, %v751_v26  ;;  %v1595_v35 = vpop.f32.mrb[28].mxu0  ;;  %v1627_v36 = vpop.f32.mrb[28].mxu1 }
 0x112   :  { %1511 = vst [vmem:[%s1915_s2 + $0x68] sm:$0xff] %v1407_v29   ;;  %v1402_v37 = vpack.c.bf16 %v783_v33, %v782_v28  ;;  %v1482_v38 = vpack.c.bf16 %v815_v34, %v814_v31  ;;  %vm660_vm9 = vcmp.ge.f32.partialorder %v1595_v35, 0.0  ;;  %v724_v39 = vmul.f32 0.2, %v1595_v35  ;;  %v487_v40 = vpop.f32.mrb[29].mxu0  ;;  %v615_v41 = vpop.f32.mrb[29].mxu1 }
 0x113   :  { %1527 = vst [vmem:[%s1915_s2 + $0xe8] sm:$0xff] %v1487_v32   ;;  %vm692_vm10 = vcmp.ge.f32.partialorder %v1627_v36, 0.0  ;;  %v756_v42 = vmul.f32 0.2, %v1627_v36  ;;  %v722_v43 = vmul.f32 0.2, %v487_v40 }
 0x114   :  { %1510 = vst [vmem:[%s1915_s2 + $0x60] sm:$0xff] %v1402_v37   ;;  %1526 = vst [vmem:[%s1915_s2 + $0xe0] sm:$0xff] %v1482_v38   ;;  %v754_v44 = vmul.f32 0.2, %v615_v41  ;;  %v1596_v45 = vpop.f32.mrb[30].mxu0  ;;  %v1628_v46 = vpop.f32.mrb[30].mxu1  ;;  %v788_v47 = vsel %vm660_vm9, %v1595_v35, %v724_v39 }
 0x115   :  { %vm658_vm11 = vcmp.ge.f32.partialorder %v487_v40, 0.0  ;;  %vm661_vm12 = vcmp.ge.f32.partialorder %v1596_v45, 0.0  ;;  %v725_v48 = vmul.f32 0.2, %v1596_v45  ;;  %v490_v49 = vpop.f32.mrb[31].mxu0  ;;  %v618_v50 = vpop.f32.mrb[31].mxu1  ;;  %v820_v55 = vsel %vm692_vm10, %v1627_v36, %v756_v42 }
 0x116   :  { %vm690_vm13 = vcmp.ge.f32.partialorder %v615_v41, 0.0  ;;  %vm693_vm14 = vcmp.ge.f32.partialorder %v1628_v46, 0.0  ;;  %v757_v51 = vmul.f32 0.2, %v1628_v46  ;;  %vm659_vm15 = vcmp.ge.f32.partialorder %v490_v49, 0.0 }
 0x117   :  { %v789_v52 = vsel %vm661_vm12, %v1596_v45, %v725_v48  ;;  %v723_v53 = vmul.f32 0.2, %v490_v49  ;;  %vm691_vm0 = vcmp.ge.f32.partialorder %v618_v50, 0.0  ;;  %v755_v54 = vmul.f32 0.2, %v618_v50 }
 0x118   :  { %v786_v56 = vsel %vm658_vm11, %v487_v40, %v722_v43  ;;  %v1417_v57 = vpack.c.bf16 %v789_v52, %v788_v47  ;;  %v821_v58 = vsel %vm693_vm14, %v1628_v46, %v757_v51  ;;  %v818_v59 = vsel %vm690_vm13, %v615_v41, %v754_v44 }
 0x119   :  { %v1497_v60 = vpack.c.bf16 %v821_v58, %v820_v55  ;;  %v787_v61 = vsel %vm659_vm15, %v490_v49, %v723_v53  ;;  %v819_v62 = vsel %vm691_vm0, %v618_v50, %v755_v54 }
 0x11a   :  { %1513 = vst [vmem:[%s1915_s2 + $0x78] sm:$0xff] %v1417_v57   ;;  %v1412_v63 = vpack.c.bf16 %v787_v61, %v786_v56  ;;  %v1492_v0 = vpack.c.bf16 %v819_v62, %v818_v59 }
 0x11b   :  { %1529 = vst [vmem:[%s1915_s2 + $0xf8] sm:$0xff] %v1497_v60  }
 0x11c   :  { %1512 = vst [vmem:[%s1915_s2 + $0x70] sm:$0xff] %v1412_v63   ;;  %1528 = vst [vmem:[%s1915_s2 + $0xf0] sm:$0xff] %v1492_v0  }

// kernel: wgan_discriminator_forward.7
= control target key start
LH: loop header
LB: loop body
LE: loop exit
PB: predicated region body
PF: predicated region fallthrough
CT: control target
= control target key end

     0   :  { %s423_s0 = inlined_call_operand.vmem [shape: f32[128,128], index: 0, kind: input, shape index: {}]   ;;  %s424_s1 = inlined_call_operand.vmem [shape: f32[1,128], index: 1, kind: input, shape index: {}]   ;;  %s425_s2 = inlined_call_operand.vmem [shape: f32[1,128], index: 2, kind: input, shape index: {}]   ;;  %s426_s3 = inlined_call_operand.vmem [shape: bf16[128,128], index: 3, kind: output, shape index: {}]  }
   0x1   :  { %v14_v0 = vld [vmem:[%s423_s0] sm:$0xff]  ;;  %v15_v1 = vld [vmem:[%s423_s0 + $0x8] sm:$0xff]  ;;  %v16_v6 = vld [vmem:[%s423_s0 + $0x10] sm:$0xff] }
   0x2   :  { %v318_v2 = vld [vmem:[%s424_s1] ss:$0 sm:$0xff]  ;;  %v17_v7 = vld [vmem:[%s423_s0 + $0x18] sm:$0xff]  ;;  %v19_v11 = vld [vmem:[%s423_s0 + $0x28] sm:$0xff] }
   0x3   :  { %v37_v3 = vmul.f32 %v318_v2, %v14_v0  ;;  %v38_v4 = vmul.f32 %v318_v2, %v15_v1  ;;  %v325_v5 = vld [vmem:[%s425_s2] ss:$0 sm:$0xff]  ;;  %v39_v8 = vmul.f32 %v318_v2, %v16_v6  ;;  %v40_v9 = vmul.f32 %v318_v2, %v17_v7  ;;  %v20_v12 = vld [vmem:[%s423_s0 + $0x30] sm:$0xff]  ;;  %v21_v17 = vld [vmem:[%s423_s0 + $0x38] sm:$0xff] }
   0x4   :  { %v18_v10 = vld [vmem:[%s423_s0 + $0x20] sm:$0xff]  ;;  %v42_v16 = vmul.f32 %v318_v2, %v19_v11  ;;  %v43_v20 = vmul.f32 %v318_v2, %v20_v12  ;;  %v44_v21 = vmul.f32 %v318_v2, %v21_v17  ;;  %v23_v35 = vld [vmem:[%s423_s0 + $0x48] sm:$0xff]  ;;  %v24_v36 = vld [vmem:[%s423_s0 + $0x50] sm:$0xff] }
   0x5   :  { %v60_v13 = vadd.f32 %v325_v5, %v37_v3  ;;  %v61_v14 = vadd.f32 %v325_v5, %v38_v4  ;;  %v41_v15 = vmul.f32 %v318_v2, %v18_v10  ;;  %v62_v18 = vadd.f32 %v325_v5, %v39_v8  ;;  %v22_v34 = vld [vmem:[%s423_s0 + $0x40] sm:$0xff]  ;;  %v25_v42 = vld [vmem:[%s423_s0 + $0x58] sm:$0xff]  ;;  %v27_v48 = vld [vmem:[%s423_s0 + $0x68] sm:$0xff] }
   0x6   :  { %v63_v19 = vadd.f32 %v325_v5, %v40_v9  ;;  %v65_v29 = vadd.f32 %v325_v5, %v42_v16  ;;  %v66_v33 = vadd.f32 %v325_v5, %v43_v20  ;;  %v67_v40 = vadd.f32 %v325_v5, %v44_v21  ;;  %v26_v47 = vld [vmem:[%s423_s0 + $0x60] sm:$0xff]  ;;  %v28_v60 = vld [vmem:[%s423_s0 + $0x70] sm:$0xff]  ;;  %v29_v7 = vld [vmem:[%s423_s0 + $0x78] sm:$0xff] }
   0x7   :  { %vm76_vm0 = vcmp.ge.f32.partialorder %v60_v13, 0.0  ;;  %vm77_vm1 = vcmp.ge.f32.partialorder %v61_v14, 0.0  ;;  %v92_v22 = vmul.f32 0.2, %v60_v13  ;;  %v93_v23 = vmul.f32 0.2, %v61_v14 }
   0x8   :  { %vm78_vm2 = vcmp.ge.f32.partialorder %v62_v18, 0.0  ;;  %vm79_vm3 = vcmp.ge.f32.partialorder %v63_v19, 0.0  ;;  %v94_v24 = vmul.f32 0.2, %v62_v18  ;;  %v95_v25 = vmul.f32 0.2, %v63_v19 }
   0x9   :  { %v108_v26 = vsel %vm76_vm0, %v60_v13, %v92_v22  ;;  %v109_v27 = vsel %vm77_vm1, %v61_v14, %v93_v23  ;;  %v64_v28 = vadd.f32 %v325_v5, %v41_v15  ;;  %vm81_vm5 = vcmp.ge.f32.partialorder %v65_v29, 0.0 }
   0xa   :  { %v245_v30 = vpack.c.bf16 %v109_v27, %v108_v26  ;;  %v110_v31 = vsel %vm78_vm2, %v62_v18, %v94_v24  ;;  %v111_v32 = vsel %vm79_vm3, %v63_v19, %v95_v25  ;;  %v97_v39 = vmul.f32 0.2, %v65_v29 }
   0xb   :  { %v250_v37 = vpack.c.bf16 %v111_v32, %v110_v31  ;;  %vm80_vm4 = vcmp.ge.f32.partialorder %v64_v28, 0.0  ;;  %v96_v38 = vmul.f32 0.2, %v64_v28  ;;  %vm82_vm6 = vcmp.ge.f32.partialorder %v66_v33, 0.0 }
   0xc   :  { %246 = vst [vmem:[%s426_s3] sm:$0xff] %v245_v30   ;;  %v98_v41 = vmul.f32 0.2, %v66_v33  ;;  %v45_v44 = vmul.f32 %v318_v2, %v22_v34  ;;  %v46_v45 = vmul.f32 %v318_v2, %v23_v35  ;;  %v47_v46 = vmul.f32 %v318_v2, %v24_v36 }
   0xd   :  { %282 = vst [vmem:[%s426_s3 + $0x8] sm:$0xff] %v250_v37   ;;  %v112_v43 = vsel %vm80_vm4, %v64_v28, %v96_v38  ;;  %v113_v49 = vsel %vm81_vm5, %v65_v29, %v97_v39  ;;  %vm83_vm7 = vcmp.ge.f32.partialorder %v67_v40, 0.0  ;;  %v99_v50 = vmul.f32 0.2, %v67_v40 }
   0xe   :  { %v114_v51 = vsel %vm82_vm6, %v66_v33, %v98_v41  ;;  %v255_v52 = vpack.c.bf16 %v113_v49, %v112_v43  ;;  %v68_v53 = vadd.f32 %v325_v5, %v45_v44  ;;  %v69_v54 = vadd.f32 %v325_v5, %v46_v45 }
   0xf   :  { %v48_v55 = vmul.f32 %v318_v2, %v25_v42  ;;  %v115_v56 = vsel %vm83_vm7, %v67_v40, %v99_v50  ;;  %v70_v57 = vadd.f32 %v325_v5, %v47_v46  ;;  %v49_v58 = vmul.f32 %v318_v2, %v26_v47 }
  0x10   :  { %v50_v59 = vmul.f32 %v318_v2, %v27_v48  ;;  %283 = vst [vmem:[%s426_s3 + $0x10] sm:$0xff] %v255_v52   ;;  %v260_v61 = vpack.c.bf16 %v115_v56, %v114_v51  ;;  %vm84_vm8 = vcmp.ge.f32.partialorder %v68_v53, 0.0  ;;  %vm85_vm9 = vcmp.ge.f32.partialorder %v69_v54, 0.0 }
  0x11   :  { %v100_v62 = vmul.f32 0.2, %v68_v53  ;;  %v101_v63 = vmul.f32 0.2, %v69_v54  ;;  %v71_v0 = vadd.f32 %v325_v5, %v48_v55  ;;  %vm86_vm10 = vcmp.ge.f32.partialorder %v70_v57, 0.0 }
  0x12   :  { %v102_v1 = vmul.f32 0.2, %v70_v57  ;;  %284 = vst [vmem:[%s426_s3 + $0x18] sm:$0xff] %v260_v61   ;;  %v72_v4 = vadd.f32 %v325_v5, %v49_v58  ;;  %v73_v6 = vadd.f32 %v325_v5, %v50_v59  ;;  %v51_v8 = vmul.f32 %v318_v2, %v28_v60 }
  0x13   :  { %v116_v3 = vsel %vm84_vm8, %v68_v53, %v100_v62  ;;  %v117_v9 = vsel %vm85_vm9, %v69_v54, %v101_v63  ;;  %vm87_vm11 = vcmp.ge.f32.partialorder %v71_v0, 0.0  ;;  %v103_v10 = vmul.f32 0.2, %v71_v0 }
  0x14   :  { %v118_v11 = vsel %vm86_vm10, %v70_v57, %v102_v1  ;;  %v265_v12 = vpack.c.bf16 %v117_v9, %v116_v3  ;;  %vm88_vm12 = vcmp.ge.f32.partialorder %v72_v4, 0.0  ;;  %vm89_vm13 = vcmp.ge.f32.partialorder %v73_v6, 0.0 }
  0x15   :  { %v104_v13 = vmul.f32 0.2, %v72_v4  ;;  %v119_v14 = vsel %vm87_vm11, %v71_v0, %v103_v10  ;;  %v105_v15 = vmul.f32 0.2, %v73_v6  ;;  %v52_v16 = vmul.f32 %v318_v2, %v29_v7 }
  0x16   :  { %v74_v17 = vadd.f32 %v325_v5, %v51_v8  ;;  %285 = vst [vmem:[%s426_s3 + $0x20] sm:$0xff] %v265_v12   ;;  %v270_v18 = vpack.c.bf16 %v119_v14, %v118_v11 }
  0x17   :  { %v120_v19 = vsel %vm88_vm12, %v72_v4, %v104_v13  ;;  %v121_v20 = vsel %vm89_vm13, %v73_v6, %v105_v15  ;;  %v75_v21 = vadd.f32 %v325_v5, %v52_v16 }
  0x18   :  { %vm90_vm14 = vcmp.ge.f32.partialorder %v74_v17, 0.0  ;;  %v106_v22 = vmul.f32 0.2, %v74_v17  ;;  %286 = vst [vmem:[%s426_s3 + $0x28] sm:$0xff] %v270_v18   ;;  %v275_v23 = vpack.c.bf16 %v121_v20, %v120_v19 }
  0x19   :  { %vm91_vm15 = vcmp.ge.f32.partialorder %v75_v21, 0.0  ;;  %v107_v2 = vmul.f32 0.2, %v75_v21 }
  0x1a   :  { %v122_v24 = vsel %vm90_vm14, %v74_v17, %v106_v22  ;;  %287 = vst [vmem:[%s426_s3 + $0x30] sm:$0xff] %v275_v23  }
  0x1b   :  { %v123_v25 = vsel %vm91_vm15, %v75_v21, %v107_v2 }
  0x1c   :  { %v280_v26 = vpack.c.bf16 %v123_v25, %v122_v24 }
  0x1e   :  { %288 = vst [vmem:[%s426_s3 + $0x38] sm:$0xff] %v280_v26  }

// kernel: wgan_discriminator_forward.6
= control target key start
LH: loop header
LB: loop body
LE: loop exit
PB: predicated region body
PF: predicated region fallthrough
CT: control target
= control target key end

     0   :  { %vm409_vm0 = vcmask 1040384   ;;  %s757_s1 = inlined_call_operand.vmem [shape: bf16[256,128], index: 1, kind: input, shape index: {}]   ;;  %s758_s0 = inlined_call_operand.vmem [shape: bf16[128,256], index: 0, kind: input, shape index: {}]   ;;  %s759_s2 = inlined_call_operand.vmem [shape: f32[128,128], index: 2, kind: output, shape index: {0}]   ;;  %s760_s3 = inlined_call_operand.vmem [shape: f32[1,2,128], index: 3, kind: output, shape index: {1}]  }
   0x1   :  { %v532_v0 = vld [vmem:[%s757_s1 + $0x40] sm:$0xff]   ;;  %v534_v2 = vld [vmem:[%s757_s1 + $0x48] sm:$0xff]   ;;  %v536_v4 = vld [vmem:[%s757_s1 + $0x50] sm:$0xff]  }
   0x2   :  { %v533_v1 = vld [vmem:[%s757_s1] sm:$0xff]   ;;  %452 = vmatprep.subr.bf16.mxu0 %v532_v0  ;;  %516 = vmatprep.subr.bf16.mxu1 %v532_v0  ;;  %v535_v3 = vld [vmem:[%s757_s1 + $0x8] sm:$0xff]   ;;  %v537_v5 = vld [vmem:[%s757_s1 + $0x10] sm:$0xff]  }
   0x3   :  { %453 = vmatpush3.bf16.msra.mxu0 %v533_v1  ;;  %524 = vmatpush3.bf16.msra.mxu1 %v533_v1  ;;  %v538_v6 = vld [vmem:[%s757_s1 + $0x58] sm:$0xff]   ;;  %v540_v8 = vld [vmem:[%s757_s1 + $0x60] sm:$0xff]   ;;  %v542_v10 = vld [vmem:[%s757_s1 + $0x68] sm:$0xff]  }
   0x4   :  { %454 = vmatprep.subr.bf16.mxu0 %v534_v2  ;;  %517 = vmatprep.subr.bf16.mxu1 %v534_v2  ;;  %v539_v7 = vld [vmem:[%s757_s1 + $0x18] sm:$0xff]   ;;  %v541_v9 = vld [vmem:[%s757_s1 + $0x20] sm:$0xff]   ;;  %v543_v12 = vld [vmem:[%s757_s1 + $0x28] sm:$0xff]  }
   0x5   :  { %v550_v11 = vld [vmem:[%s758_s0 + $0x4] ss:$8 sps:$4 sm:$0xff]   ;;  %v544_v14 = vld [vmem:[%s757_s1 + $0x70] sm:$0xff]   ;;  %v546_v16 = vld [vmem:[%s757_s1 + $0x78] sm:$0xff]  }
   0x6   :  { %v556_v13 = vld [vmem:[%s758_s0 + $0x44] ss:$8 sps:$4 sm:$0xff]   ;;  %270 = vmatprep.mubr.bf16.mxu0 %v550_v11  ;;  %v545_v15 = vld [vmem:[%s757_s1 + $0x30] sm:$0xff]   ;;  %v547_v17 = vld [vmem:[%s757_s1 + $0x38] sm:$0xff]  }
   0x7   :  { %455 = vmatpush3.bf16.msra.mxu0 %v535_v3  ;;  %525 = vmatpush3.bf16.msra.mxu1 %v535_v3  ;;  %v548_v18 = vld [vmem:[%s758_s0] ss:$8 sps:$4 sm:$0xff]   ;;  %v551_v20 = vld [vmem:[%s758_s0 + $0x14] ss:$8 sps:$4 sm:$0xff]   ;;  %v553_v22 = vld [vmem:[%s758_s0 + $0x10] ss:$8 sps:$4 sm:$0xff]  }
   0x8   :  { %456 = vmatprep.subr.bf16.mxu0 %v536_v4  ;;  %518 = vmatprep.subr.bf16.mxu1 %v536_v4  ;;  %v554_v19 = vld [vmem:[%s758_s0 + $0x40] ss:$8 sps:$4 sm:$0xff]   ;;  %v560_v21 = vld [vmem:[%s758_s0 + $0x54] ss:$8 sps:$4 sm:$0xff]   ;;  %v562_v23 = vld [vmem:[%s758_s0 + $0x50] ss:$8 sps:$4 sm:$0xff]  }
   0x9   :  { %302 = vmatprep.mubr.bf16.mxu1 %v556_v13  ;;  %v557_v24 = vld [vmem:[%s758_s0 + $0x24] ss:$8 sps:$4 sm:$0xff]   ;;  %v559_v26 = vld [vmem:[%s758_s0 + $0x20] ss:$8 sps:$4 sm:$0xff]   ;;  %v563_v28 = vld [vmem:[%s758_s0 + $0x34] ss:$8 sps:$4 sm:$0xff]  }
   0xa   :  { %v566_v25 = vld [vmem:[%s758_s0 + $0x64] ss:$8 sps:$4 sm:$0xff]   ;;  %v568_v27 = vld [vmem:[%s758_s0 + $0x60] ss:$8 sps:$4 sm:$0xff]   ;;  %v569_v29 = vld [vmem:[%s758_s0 + $0x74] ss:$8 sps:$4 sm:$0xff]  }
   0xb   :  { %457 = vmatpush3.bf16.msra.mxu0 %v537_v5  ;;  %526 = vmatpush3.bf16.msra.mxu1 %v537_v5  ;;  %v565_v30 = vld [vmem:[%s758_s0 + $0x30] ss:$8 sps:$4 sm:$0xff]  }
   0xc   :  { %458 = vmatprep.subr.bf16.mxu0 %v538_v6  ;;  %519 = vmatprep.subr.bf16.mxu1 %v538_v6  ;;  %v571_v31 = vld [vmem:[%s758_s0 + $0x70] ss:$8 sps:$4 sm:$0xff]  }
   0xf   :  { %459 = vmatpush3.bf16.msra.mxu0 %v539_v7  ;;  %527 = vmatpush3.bf16.msra.mxu1 %v539_v7 }
  0x10   :  { %460 = vmatprep.subr.bf16.mxu0 %v540_v8  ;;  %520 = vmatprep.subr.bf16.mxu1 %v540_v8 }
  0x13   :  { %461 = vmatpush3.bf16.msra.mxu0 %v541_v9  ;;  %528 = vmatpush3.bf16.msra.mxu1 %v541_v9 }
  0x14   :  { %462 = vmatprep.subr.bf16.mxu0 %v542_v10  ;;  %521 = vmatprep.subr.bf16.mxu1 %v542_v10 }
  0x17   :  { %463 = vmatpush3.bf16.msra.mxu0 %v543_v12  ;;  %529 = vmatpush3.bf16.msra.mxu1 %v543_v12 }
  0x18   :  { %464 = vmatprep.subr.bf16.mxu0 %v544_v14  ;;  %522 = vmatprep.subr.bf16.mxu1 %v544_v14 }
  0x1b   :  { %465 = vmatpush3.bf16.msra.mxu0 %v545_v15  ;;  %530 = vmatpush3.bf16.msra.mxu1 %v545_v15 }
  0x1c   :  { %466 = vmatprep.subr.bf16.mxu0 %v546_v16  ;;  %523 = vmatprep.subr.bf16.mxu1 %v546_v16 }
  0x1f   :  { %467 = vmatpush3.bf16.msra.mxu0 %v547_v17  ;;  %531 = vmatpush3.bf16.msra.mxu1 %v547_v17 }
  0x22   :  { %271 = vmatmul.mubr.bf16.vlgmr.msra.gmra.mrb[0].mxu0 %v548_v18  ;;  %303 = vmatmul.mubr.bf16.vlgmr.msra.gmra.mrb[0].mxu1 %v554_v19 }
  0x23   :  { %278 = vmatprep.mubr.bf16.mxu0 %v551_v20  ;;  %310 = vmatprep.mubr.bf16.mxu1 %v560_v21 }
  0x2a   :  { %279 = vmatmul.mubr.bf16.gmra.mrb[4].mxu0 %v553_v22  ;;  %311 = vmatmul.mubr.bf16.gmra.mrb[4].mxu1 %v562_v23 }
  0x2b   :  { %286 = vmatprep.mubr.bf16.mxu0 %v557_v24  ;;  %318 = vmatprep.mubr.bf16.mxu1 %v566_v25 }
  0x32   :  { %287 = vmatmul.mubr.bf16.gmra.mrb[8].mxu0 %v559_v26  ;;  %319 = vmatmul.mubr.bf16.gmra.mrb[8].mxu1 %v568_v27 }
  0x33   :  { %294 = vmatprep.mubr.bf16.mxu0 %v563_v28  ;;  %326 = vmatprep.mubr.bf16.mxu1 %v569_v29 }
  0x3a   :  { %295 = vmatmul.mubr.bf16.gmra.mrb[12].mxu0 %v565_v30  ;;  %327 = vmatmul.mubr.bf16.gmra.mrb[12].mxu1 %v571_v31 }
  0xf5   :  { %v468_v32 = vpop.f32.mrb[0].mxu0  ;;  %v492_v33 = vpop.f32.mrb[0].mxu1 }
  0xf6   :  { %v469_v34 = vpop.f32.mrb[1].mxu0  ;;  %v493_v35 = vpop.f32.mrb[1].mxu1 }
  0xf7   :  { %v470_v36 = vadd.f32 %v469_v34, %v468_v32  ;;  %v471_v37 = vpop.f32.mrb[2].mxu0  ;;  %v688_v38 = vadd.f32 %v493_v35, %v492_v33  ;;  %v495_v39 = vpop.f32.mrb[2].mxu1 }
  0xf8   :  { %v472_v40 = vpop.f32.mrb[3].mxu0  ;;  %v496_v41 = vpop.f32.mrb[3].mxu1 }
  0xf9   :  { %335 = vst [vmem:[%s759_s2] sm:$0xff] %v470_v36  ;;  %v473_v42 = vadd.f32 %v472_v40, %v471_v37  ;;  %343 = vst [vmem:[%s759_s2 + $0x40] sm:$0xff] %v688_v38  ;;  %v697_v43 = vadd.f32 %v496_v41, %v495_v39  ;;  %v372_v44 = vmul.f32 %v470_v36, %v470_v36 }
  0xfa   :  { %v380_v37 = vmul.f32 %v688_v38, %v688_v38 }
  0xfb   :  { %336 = vst [vmem:[%s759_s2 + $0x8] sm:$0xff] %v473_v42  ;;  %v351_v45 = vadd.f32 %v473_v42, %v470_v36  ;;  %v373_v46 = vmul.f32 %v473_v42, %v473_v42  ;;  %344 = vst [vmem:[%s759_s2 + $0x48] sm:$0xff] %v697_v43  ;;  %v381_v41 = vmul.f32 %v697_v43, %v697_v43 }
  0xfd   :  { %v388_v47 = vadd.f32 %v373_v46, %v372_v44  ;;  %v474_v48 = vpop.f32.mrb[4].mxu0  ;;  %v498_v49 = vpop.f32.mrb[4].mxu1 }
  0xfe   :  { %v475_v50 = vpop.f32.mrb[5].mxu0  ;;  %v499_v51 = vpop.f32.mrb[5].mxu1 }
  0xff   :  { %v476_v52 = vadd.f32 %v475_v50, %v474_v48  ;;  %v477_v53 = vpop.f32.mrb[6].mxu0  ;;  %v706_v54 = vadd.f32 %v499_v51, %v498_v49  ;;  %v501_v55 = vpop.f32.mrb[6].mxu1 }
 0x100   :  { %v478_v56 = vpop.f32.mrb[7].mxu0  ;;  %v502_v57 = vpop.f32.mrb[7].mxu1 }
 0x101   :  { %337 = vst [vmem:[%s759_s2 + $0x10] sm:$0xff] %v476_v52  ;;  %v352_v58 = vadd.f32 %v476_v52, %v351_v45  ;;  %v374_v59 = vmul.f32 %v476_v52, %v476_v52  ;;  %v479_v60 = vadd.f32 %v478_v56, %v477_v53  ;;  %345 = vst [vmem:[%s759_s2 + $0x50] sm:$0xff] %v706_v54 }
 0x102   :  { %v503_v61 = vadd.f32 %v502_v57, %v501_v55  ;;  %v382_v45 = vmul.f32 %v706_v54, %v706_v54 }
 0x103   :  { %v389_v62 = vadd.f32 %v388_v47, %v374_v59  ;;  %338 = vst [vmem:[%s759_s2 + $0x18] sm:$0xff] %v479_v60  ;;  %v353_v63 = vadd.f32 %v479_v60, %v352_v58  ;;  %v375_v0 = vmul.f32 %v479_v60, %v479_v60 }
 0x104   :  { %346 = vst [vmem:[%s759_s2 + $0x58] sm:$0xff] %v503_v61  ;;  %v383_v48 = vmul.f32 %v503_v61, %v503_v61 }
 0x105   :  { %v390_v1 = vadd.f32 %v389_v62, %v375_v0  ;;  %v480_v2 = vpop.f32.mrb[8].mxu0  ;;  %v504_v3 = vpop.f32.mrb[8].mxu1 }
 0x106   :  { %v481_v4 = vpop.f32.mrb[9].mxu0  ;;  %v505_v5 = vpop.f32.mrb[9].mxu1 }
 0x107   :  { %v482_v6 = vadd.f32 %v481_v4, %v480_v2  ;;  %v483_v7 = vpop.f32.mrb[10].mxu0  ;;  %v506_v8 = vadd.f32 %v505_v5, %v504_v3  ;;  %v507_v9 = vpop.f32.mrb[10].mxu1 }
 0x108   :  { %v484_v10 = vpop.f32.mrb[11].mxu0  ;;  %v508_v11 = vpop.f32.mrb[11].mxu1 }
 0x109   :  { %339 = vst [vmem:[%s759_s2 + $0x20] sm:$0xff] %v482_v6  ;;  %v354_v12 = vadd.f32 %v482_v6, %v353_v63  ;;  %v376_v13 = vmul.f32 %v482_v6, %v482_v6  ;;  %v485_v14 = vadd.f32 %v484_v10, %v483_v7  ;;  %347 = vst [vmem:[%s759_s2 + $0x60] sm:$0xff] %v506_v8 }
 0x10a   :  { %v509_v15 = vadd.f32 %v508_v11, %v507_v9  ;;  %v384_v52 = vmul.f32 %v506_v8, %v506_v8 }
 0x10b   :  { %v391_v16 = vadd.f32 %v390_v1, %v376_v13  ;;  %340 = vst [vmem:[%s759_s2 + $0x28] sm:$0xff] %v485_v14  ;;  %v355_v17 = vadd.f32 %v485_v14, %v354_v12  ;;  %v377_v18 = vmul.f32 %v485_v14, %v485_v14 }
 0x10c   :  { %348 = vst [vmem:[%s759_s2 + $0x68] sm:$0xff] %v509_v15  ;;  %v385_v56 = vmul.f32 %v509_v15, %v509_v15 }
 0x10d   :  { %v392_v19 = vadd.f32 %v391_v16, %v377_v18  ;;  %v486_v20 = vpop.f32.mrb[12].mxu0  ;;  %v510_v21 = vpop.f32.mrb[12].mxu1 }
 0x10e   :  { %v487_v22 = vpop.f32.mrb[13].mxu0  ;;  %v511_v23 = vpop.f32.mrb[13].mxu1 }
 0x10f   :  { %v488_v24 = vadd.f32 %v487_v22, %v486_v20  ;;  %v489_v25 = vpop.f32.mrb[14].mxu0  ;;  %v512_v26 = vadd.f32 %v511_v23, %v510_v21  ;;  %v513_v27 = vpop.f32.mrb[14].mxu1 }
 0x110   :  { %v490_v28 = vpop.f32.mrb[15].mxu0  ;;  %v514_v29 = vpop.f32.mrb[15].mxu1 }
 0x111   :  { %341 = vst [vmem:[%s759_s2 + $0x30] sm:$0xff] %v488_v24  ;;  %v356_v30 = vadd.f32 %v488_v24, %v355_v17  ;;  %v378_v31 = vmul.f32 %v488_v24, %v488_v24  ;;  %v491_v32 = vadd.f32 %v490_v28, %v489_v25  ;;  %349 = vst [vmem:[%s759_s2 + $0x70] sm:$0xff] %v512_v26 }
 0x112   :  { %v515_v33 = vadd.f32 %v514_v29, %v513_v27  ;;  %v386_v57 = vmul.f32 %v512_v26, %v512_v26 }
 0x113   :  { %v393_v34 = vadd.f32 %v392_v19, %v378_v31  ;;  %342 = vst [vmem:[%s759_s2 + $0x38] sm:$0xff] %v491_v32  ;;  %v357_v35 = vadd.f32 %v491_v32, %v356_v30  ;;  %v379_v36 = vmul.f32 %v491_v32, %v491_v32 }
 0x114   :  { %350 = vst [vmem:[%s759_s2 + $0x78] sm:$0xff] %v515_v33  ;;  %v387_v62 = vmul.f32 %v515_v33, %v515_v33 }
 0x115   :  { %v358_v39 = vadd.f32 %v688_v38, %v357_v35  ;;  %v394_v40 = vadd.f32 %v393_v34, %v379_v36 }
 0x117   :  { %v359_v42 = vadd.f32 %v697_v43, %v358_v39  ;;  %v395_v44 = vadd.f32 %v394_v40, %v380_v37 }
 0x119   :  { %v396_v46 = vadd.f32 %v395_v44, %v381_v41  ;;  %v360_v47 = vadd.f32 %v706_v54, %v359_v42 }
 0x11b   :  { %v361_v49 = vadd.f32 %v503_v61, %v360_v47  ;;  %v397_v50 = vadd.f32 %v396_v46, %v382_v45 }
 0x11d   :  { %v362_v51 = vadd.f32 %v506_v8, %v361_v49  ;;  %v398_v53 = vadd.f32 %v397_v50, %v383_v48 }
 0x11f   :  { %v399_v38 = vadd.f32 %v398_v53, %v384_v52  ;;  %v363_v55 = vadd.f32 %v509_v15, %v362_v51 }
 0x121   :  { %v400_v58 = vadd.f32 %v399_v38, %v385_v56  ;;  %v364_v59 = vadd.f32 %v512_v26, %v363_v55 }
 0x123   :  { %v401_v43 = vadd.f32 %v400_v58, %v386_v57  ;;  %v365_v60 = vadd.f32 %v515_v33, %v364_v59 }
 0x125   :  { %v366_v63 = vrot.slane %v365_v60, 4  ;;  %v402_v0 = vadd.f32 %v401_v43, %v387_v62 }
 0x127   :  { %v367_v1 = vadd.f32 %v366_v63, %v365_v60  ;;  %v403_v2 = vrot.slane %v402_v0, 4 }
 0x129   :  { %v368_v54 = vrot.slane %v367_v1, 2  ;;  %v404_v3 = vadd.f32 %v403_v2, %v402_v0 }
 0x12b   :  { %v369_v61 = vadd.f32 %v368_v54, %v367_v1  ;;  %v405_v4 = vrot.slane %v404_v3, 2 }
 0x12d   :  { %v370_v5 = vrot.slane %v369_v61, 1  ;;  %v406_v6 = vadd.f32 %v405_v4, %v404_v3 }
 0x12f   :  { %v407_v7 = vrot.slane %v406_v6, 1  ;;  %v371_v8 = vadd.f32 %v370_v5, %v369_v61 }
 0x131   :  { %v408_v9 = vadd.f32 %v407_v7, %v406_v6 }
 0x133   :  { %v410_v10 = vsel %vm409_vm0, %v371_v8, %v408_v9 }
 0x134   :  { %411 = vst [vmem:[%s760_s3] sm:$0x3] %v410_v10 }

// kernel: wgan_discriminator_forward.9
= control target key start
LH: loop header
LB: loop body
LE: loop exit
PB: predicated region body
PF: predicated region fallthrough
CT: control target
= control target key end

     0   :  { %s141_s0 = inlined_call_operand.vmem [shape: f32[32,128], index: 0, kind: input, shape index: {}]   ;;  %s142_s1 = inlined_call_operand.vmem [shape: f32[1,128], index: 1, kind: input, shape index: {}]   ;;  %s143_s2 = inlined_call_operand.vmem [shape: f32[1,128], index: 2, kind: input, shape index: {}]   ;;  %s144_s3 = inlined_call_operand.vmem [shape: bf16[32,128], index: 3, kind: output, shape index: {}]  }
   0x1   :  { %v14_v0 = vld [vmem:[%s141_s0] sm:$0xff]  ;;  %v15_v1 = vld [vmem:[%s141_s0 + $0x8] sm:$0xff]  ;;  %v16_v6 = vld [vmem:[%s141_s0 + $0x10] sm:$0xff] }
   0x2   :  { %v76_v2 = vld [vmem:[%s142_s1] ss:$0 sm:$0xff]  ;;  %v17_v7 = vld [vmem:[%s141_s0 + $0x18] sm:$0xff] }
   0x3   :  { %v25_v3 = vmul.f32 %v76_v2, %v14_v0  ;;  %v26_v4 = vmul.f32 %v76_v2, %v15_v1  ;;  %v77_v5 = vld [vmem:[%s143_s2] ss:$0 sm:$0xff]  ;;  %v27_v8 = vmul.f32 %v76_v2, %v16_v6  ;;  %v28_v9 = vmul.f32 %v76_v2, %v17_v7 }
   0x5   :  { %v36_v10 = vadd.f32 %v77_v5, %v25_v3  ;;  %v37_v11 = vadd.f32 %v77_v5, %v26_v4  ;;  %v38_v12 = vadd.f32 %v77_v5, %v27_v8  ;;  %v39_v13 = vadd.f32 %v77_v5, %v28_v9 }
   0x7   :  { %vm40_vm0 = vcmp.ge.f32.partialorder %v36_v10, 0.0  ;;  %vm41_vm1 = vcmp.ge.f32.partialorder %v37_v11, 0.0  ;;  %v44_v14 = vmul.f32 0.2, %v36_v10  ;;  %v45_v15 = vmul.f32 0.2, %v37_v11 }
   0x8   :  { %vm42_vm2 = vcmp.ge.f32.partialorder %v38_v12, 0.0  ;;  %vm43_vm3 = vcmp.ge.f32.partialorder %v39_v13, 0.0  ;;  %v46_v16 = vmul.f32 0.2, %v38_v12  ;;  %v47_v17 = vmul.f32 0.2, %v39_v13 }
   0x9   :  { %v48_v18 = vsel %vm40_vm0, %v36_v10, %v44_v14  ;;  %v49_v19 = vsel %vm41_vm1, %v37_v11, %v45_v15 }
   0xa   :  { %v89_v20 = vpack.c.bf16 %v49_v19, %v48_v18  ;;  %v50_v21 = vsel %vm42_vm2, %v38_v12, %v46_v16  ;;  %v51_v22 = vsel %vm43_vm3, %v39_v13, %v47_v17 }
   0xb   :  { %v94_v23 = vpack.c.bf16 %v51_v22, %v50_v21 }
   0xc   :  { %90 = vst [vmem:[%s144_s3] sm:$0xff] %v89_v20  }
   0xd   :  { %96 = vst [vmem:[%s144_s3 + $0x8] sm:$0xff] %v94_v23  }

// kernel: wgan_discriminator_forward.8
= control target key start
LH: loop header
LB: loop body
LE: loop exit
PB: predicated region body
PF: predicated region fallthrough
CT: control target
= control target key end

     0   :  { %vm442_vm0 = vcmask 1040384   ;;  %s748_s1 = inlined_call_operand.vmem [shape: bf16[512,128], index: 1, kind: input, shape index: {}]   ;;  %s749_s0 = inlined_call_operand.vmem [shape: bf16[32,512], index: 0, kind: input, shape index: {}]   ;;  %s750_s2 = inlined_call_operand.vmem [shape: f32[32,128], index: 2, kind: output, shape index: {0}]   ;;  %s751_s3 = inlined_call_operand.vmem [shape: f32[1,2,128], index: 3, kind: output, shape index: {1}]  }
   0x1   :  { %v549_v0 = vld [vmem:[%s748_s1 + $0x40] sm:$0xff]   ;;  %v553_v4 = vld [vmem:[%s748_s1 + $0x48] sm:$0xff]   ;;  %v557_v8 = vld [vmem:[%s748_s1 + $0x50] sm:$0xff]  }
   0x2   :  { %v550_v1 = vld [vmem:[%s748_s1 + $0xc0] sm:$0xff]   ;;  %493 = vmatprep.subr.bf16.mxu0 %v549_v0  ;;  %v554_v5 = vld [vmem:[%s748_s1 + $0xc8] sm:$0xff]   ;;  %v558_v9 = vld [vmem:[%s748_s1 + $0xd0] sm:$0xff]  }
   0x3   :  { %v551_v2 = vld [vmem:[%s748_s1] sm:$0xff]   ;;  %521 = vmatprep.subr.bf16.mxu1 %v550_v1  ;;  %v555_v6 = vld [vmem:[%s748_s1 + $0x8] sm:$0xff]   ;;  %v559_v10 = vld [vmem:[%s748_s1 + $0x10] sm:$0xff]  }
   0x4   :  { %v552_v3 = vld [vmem:[%s748_s1 + $0x80] sm:$0xff]   ;;  %494 = vmatpush3.bf16.msra.mxu0 %v551_v2  ;;  %v556_v7 = vld [vmem:[%s748_s1 + $0x88] sm:$0xff]   ;;  %v560_v11 = vld [vmem:[%s748_s1 + $0x90] sm:$0xff]  }
   0x5   :  { %522 = vmatpush3.bf16.msra.mxu1 %v552_v3  ;;  %495 = vmatprep.subr.bf16.mxu0 %v553_v4  ;;  %v561_v12 = vld [vmem:[%s748_s1 + $0x58] sm:$0xff]   ;;  %v565_v16 = vld [vmem:[%s748_s1 + $0x60] sm:$0xff]   ;;  %v569_v20 = vld [vmem:[%s748_s1 + $0x68] sm:$0xff]  }
   0x6   :  { %523 = vmatprep.subr.bf16.mxu1 %v554_v5  ;;  %v562_v13 = vld [vmem:[%s748_s1 + $0xd8] sm:$0xff]   ;;  %v566_v17 = vld [vmem:[%s748_s1 + $0xe0] sm:$0xff]   ;;  %v570_v21 = vld [vmem:[%s748_s1 + $0xe8] sm:$0xff]  }
   0x7   :  { %v563_v14 = vld [vmem:[%s748_s1 + $0x18] sm:$0xff]   ;;  %v567_v18 = vld [vmem:[%s748_s1 + $0x20] sm:$0xff]   ;;  %v571_v22 = vld [vmem:[%s748_s1 + $0x28] sm:$0xff]  }
   0x8   :  { %496 = vmatpush3.bf16.msra.mxu0 %v555_v6  ;;  %v564_v15 = vld [vmem:[%s748_s1 + $0x98] sm:$0xff]   ;;  %v568_v19 = vld [vmem:[%s748_s1 + $0xa0] sm:$0xff]   ;;  %v572_v23 = vld [vmem:[%s748_s1 + $0xa8] sm:$0xff]  }
   0x9   :  { %524 = vmatpush3.bf16.msra.mxu1 %v556_v7  ;;  %497 = vmatprep.subr.bf16.mxu0 %v557_v8  ;;  %v573_v24 = vld [vmem:[%s748_s1 + $0x70] sm:$0xff]   ;;  %v577_v28 = vld [vmem:[%s748_s1 + $0x78] sm:$0xff]  }
   0xa   :  { %525 = vmatprep.subr.bf16.mxu1 %v558_v9  ;;  %v574_v25 = vld [vmem:[%s748_s1 + $0xf0] sm:$0xff]   ;;  %v578_v29 = vld [vmem:[%s748_s1 + $0xf8] sm:$0xff]  }
   0xb   :  { %v575_v26 = vld [vmem:[%s748_s1 + $0x30] sm:$0xff]   ;;  %v579_v30 = vld [vmem:[%s748_s1 + $0x38] sm:$0xff]  }
   0xc   :  { %498 = vmatpush3.bf16.msra.mxu0 %v559_v10  ;;  %v576_v27 = vld [vmem:[%s748_s1 + $0xb0] sm:$0xff]   ;;  %v580_v31 = vld [vmem:[%s748_s1 + $0xb8] sm:$0xff]  }
   0xd   :  { %526 = vmatpush3.bf16.msra.mxu1 %v560_v11  ;;  %499 = vmatprep.subr.bf16.mxu0 %v561_v12  ;;  %v581_v32 = vld [vmem:[%s749_s0] ss:$16 sps:$4 sm:$0xff]   ;;  %v583_v33 = vld [vmem:[%s749_s0 + $0x4] ss:$16 sps:$4 sm:$0xff]   ;;  %v584_v34 = vld [vmem:[%s749_s0 + $0x8] ss:$16 sps:$4 sm:$0xff]  }
   0xe   :  { %527 = vmatprep.subr.bf16.mxu1 %v562_v13  ;;  %v586_v35 = vld [vmem:[%s749_s0 + $0xc] ss:$16 sps:$4 sm:$0xff]   ;;  %350 = vmatprep.mubr.bf16.mxu0 %v583_v33  ;;  %v587_v36 = vld [vmem:[%s749_s0 + $0x24] ss:$16 sps:$4 sm:$0xff]   ;;  %v591_v38 = vld [vmem:[%s749_s0 + $0x20] ss:$16 sps:$4 sm:$0xff]  }
   0xf   :  { %399 = vmatprep.mubr.bf16.mxu1 %v586_v35  ;;  %v589_v37 = vld [vmem:[%s749_s0 + $0x2c] ss:$16 sps:$4 sm:$0xff]   ;;  %v592_v39 = vld [vmem:[%s749_s0 + $0x28] ss:$16 sps:$4 sm:$0xff]  }
  0x10   :  { %500 = vmatpush3.bf16.msra.mxu0 %v563_v14 }
  0x11   :  { %528 = vmatpush3.bf16.msra.mxu1 %v564_v15  ;;  %501 = vmatprep.subr.bf16.mxu0 %v565_v16 }
  0x12   :  { %529 = vmatprep.subr.bf16.mxu1 %v566_v17 }
  0x14   :  { %502 = vmatpush3.bf16.msra.mxu0 %v567_v18 }
  0x15   :  { %530 = vmatpush3.bf16.msra.mxu1 %v568_v19  ;;  %503 = vmatprep.subr.bf16.mxu0 %v569_v20 }
  0x16   :  { %531 = vmatprep.subr.bf16.mxu1 %v570_v21 }
  0x18   :  { %504 = vmatpush3.bf16.msra.mxu0 %v571_v22 }
  0x19   :  { %532 = vmatpush3.bf16.msra.mxu1 %v572_v23  ;;  %505 = vmatprep.subr.bf16.mxu0 %v573_v24 }
  0x1a   :  { %533 = vmatprep.subr.bf16.mxu1 %v574_v25 }
  0x1c   :  { %506 = vmatpush3.bf16.msra.mxu0 %v575_v26 }
  0x1d   :  { %534 = vmatpush3.bf16.msra.mxu1 %v576_v27  ;;  %507 = vmatprep.subr.bf16.mxu0 %v577_v28 }
  0x1e   :  { %535 = vmatprep.subr.bf16.mxu1 %v578_v29 }
  0x20   :  { %508 = vmatpush3.bf16.msra.mxu0 %v579_v30 }
  0x21   :  { %536 = vmatpush3.bf16.msra.mxu1 %v580_v31 }
  0x23   :  { %351 = vmatmul.mubr.bf16.vlgmr.msra.gmra.mrb[0].mxu0 %v581_v32 }
  0x24   :  { %400 = vmatmul.mubr.bf16.vlgmr.msra.gmra.mrb[0].mxu1 %v584_v34  ;;  %358 = vmatprep.mubr.bf16.mxu0 %v587_v36 }
  0x25   :  { %407 = vmatprep.mubr.bf16.mxu1 %v589_v37 }
  0x2b   :  { %359 = vmatmul.mubr.bf16.gmra.mrb[4].mxu0 %v591_v38 }
  0x2c   :  { %408 = vmatmul.mubr.bf16.gmra.mrb[4].mxu1 %v592_v39 }
  0xf6   :  { %v509_v40 = vpop.f32.mrb[0].mxu0 }
  0xf7   :  { %v537_v41 = vpop.f32.mrb[0].mxu1  ;;  %v510_v42 = vpop.f32.mrb[1].mxu0 }
  0xf8   :  { %v511_v43 = vadd.f32 %v510_v42, %v509_v40  ;;  %v538_v44 = vpop.f32.mrb[1].mxu1  ;;  %v512_v45 = vpop.f32.mrb[2].mxu0 }
  0xf9   :  { %v539_v46 = vadd.f32 %v538_v44, %v537_v41  ;;  %v540_v47 = vpop.f32.mrb[2].mxu1  ;;  %v513_v48 = vpop.f32.mrb[3].mxu0 }
  0xfa   :  { %v514_v49 = vadd.f32 %v513_v48, %v512_v45  ;;  %v541_v50 = vpop.f32.mrb[3].mxu1 }
  0xfb   :  { %v402_v51 = vadd.f32 %v539_v46, %v511_v43  ;;  %v542_v52 = vadd.f32 %v541_v50, %v540_v47 }
  0xfd   :  { %416 = vst [vmem:[%s750_s2] sm:$0xff] %v402_v51  ;;  %v405_v53 = vadd.f32 %v542_v52, %v514_v49  ;;  %v429_v55 = vmul.f32 %v402_v51, %v402_v51 }
  0xfe   :  { %v515_v54 = vpop.f32.mrb[4].mxu0 }
  0xff   :  { %417 = vst [vmem:[%s750_s2 + $0x8] sm:$0xff] %v405_v53  ;;  %v420_v56 = vadd.f32 %v405_v53, %v402_v51  ;;  %v430_v57 = vmul.f32 %v405_v53, %v405_v53  ;;  %v543_v58 = vpop.f32.mrb[4].mxu1  ;;  %v516_v59 = vpop.f32.mrb[5].mxu0 }
 0x100   :  { %v517_v60 = vadd.f32 %v516_v59, %v515_v54  ;;  %v544_v61 = vpop.f32.mrb[5].mxu1  ;;  %v518_v62 = vpop.f32.mrb[6].mxu0 }
 0x101   :  { %v433_v63 = vadd.f32 %v430_v57, %v429_v55  ;;  %v545_v0 = vadd.f32 %v544_v61, %v543_v58  ;;  %v546_v1 = vpop.f32.mrb[6].mxu1  ;;  %v519_v2 = vpop.f32.mrb[7].mxu0 }
 0x102   :  { %v520_v3 = vadd.f32 %v519_v2, %v518_v62  ;;  %v547_v4 = vpop.f32.mrb[7].mxu1 }
 0x103   :  { %v410_v5 = vadd.f32 %v545_v0, %v517_v60  ;;  %v548_v6 = vadd.f32 %v547_v4, %v546_v1 }
 0x105   :  { %418 = vst [vmem:[%s750_s2 + $0x10] sm:$0xff] %v410_v5  ;;  %v421_v7 = vadd.f32 %v420_v56, %v410_v5  ;;  %v431_v8 = vmul.f32 %v410_v5, %v410_v5  ;;  %v413_v9 = vadd.f32 %v548_v6, %v520_v3 }
 0x107   :  { %v434_v10 = vadd.f32 %v433_v63, %v431_v8  ;;  %419 = vst [vmem:[%s750_s2 + $0x18] sm:$0xff] %v413_v9  ;;  %v422_v11 = vadd.f32 %v421_v7, %v413_v9  ;;  %v432_v12 = vmul.f32 %v413_v9, %v413_v9 }
 0x109   :  { %v423_v13 = vrot.slane %v422_v11, 4  ;;  %v435_v14 = vadd.f32 %v434_v10, %v432_v12 }
 0x10b   :  { %v424_v15 = vadd.f32 %v423_v13, %v422_v11  ;;  %v436_v16 = vrot.slane %v435_v14, 4 }
 0x10d   :  { %v425_v17 = vrot.slane %v424_v15, 2  ;;  %v437_v18 = vadd.f32 %v436_v16, %v435_v14 }
 0x10f   :  { %v426_v19 = vadd.f32 %v425_v17, %v424_v15  ;;  %v438_v20 = vrot.slane %v437_v18, 2 }
 0x111   :  { %v427_v21 = vrot.slane %v426_v19, 1  ;;  %v439_v22 = vadd.f32 %v438_v20, %v437_v18 }
 0x113   :  { %v440_v23 = vrot.slane %v439_v22, 1  ;;  %v428_v24 = vadd.f32 %v427_v21, %v426_v19 }
 0x115   :  { %v441_v25 = vadd.f32 %v440_v23, %v439_v22 }
 0x117   :  { %v443_v26 = vsel %vm442_vm0, %v428_v24, %v441_v25 }
 0x118   :  { %444 = vst [vmem:[%s751_s3] sm:$0x3] %v443_v26 }

</bundles_post_ra>
